<compile_context>
chip_gen: v7x
topology: tpu7x:2x2x1
jax: 0.10.0
libtpu: 0.0.40
codegen_flags: <defaults>
</compile_context>

<pallas_src>
import functools

import jax
import jax.numpy as jnp
from jax import lax
from jax.experimental import pallas as pl
from jax.experimental.pallas import tpu as pltpu


def _layernorm(x, w, b, eps=1e-5):
    mu = jnp.mean(x, axis=-1, keepdims=True)
    var = jnp.mean((x - mu) ** 2, axis=-1, keepdims=True)
    return (x - mu) * lax.rsqrt(var + eps) * w + b


def mit_kernel(x_ref, pos_ref,
               qkv_w_ref, proj_w_ref, proj_b_ref,
               fc_w_ref, fc_b_ref, cproj_w_ref, cproj_b_ref,
               ln1_w_ref, ln1_b_ref, ln2_w_ref, ln2_b_ref,
               out_ref, attn_ref, *, num_heads):
    l = pl.program_id(1)
    n_layers = pl.num_programs(1)

    # Layer 0: fuse the positional-embedding add. out_ref is the VMEM-resident carry
    # across the (arbitrary) layer axis because its block index only depends on b.
    @pl.when(l == 0)
    def _():
        out_ref[...] = x_ref[...] + pos_ref[...]          # (TB,N,D) + (1,N,D)

    x = out_ref[...]                                      # (TB, N, D) float32
    TB, N, D = x.shape
    hd = D // num_heads
    scale = hd ** -0.5
    x2 = x.reshape(TB * N, D)                             # leading-dim collapse (free)

    # ---------------- ln_1 + causal multi-head self-attention ----------------
    xn = _layernorm(x2, ln1_w_ref[0], ln1_b_ref[0])
    qkv = jnp.dot(xn.astype(jnp.bfloat16), qkv_w_ref[0],
                  preferred_element_type=jnp.float32)     # (TB*N, 3D) f32, bf16 MXU
    # Cast once to bf16; attention matmuls run single-pass on the MXU, accumulate in f32.
    q = qkv[:, 0:D].reshape(TB, N, D).astype(jnp.bfloat16)
    k = qkv[:, D:2 * D].reshape(TB, N, D).astype(jnp.bfloat16)
    v = qkv[:, 2 * D:3 * D].reshape(TB, N, D).astype(jnp.bfloat16)

    row = lax.broadcasted_iota(jnp.int32, (N, N), 0)
    col = lax.broadcasted_iota(jnp.int32, (N, N), 1)
    causal = col <= row                                   # (N, N); broadcast by jnp.where

    head_o = []
    for h in range(num_heads):                            # static unroll; batched over TB
        sl = slice(h * hd, (h + 1) * hd)
        s = jnp.einsum('bnd,bmd->bnm', q[:, :, sl], k[:, :, sl],
                       preferred_element_type=jnp.float32) * scale     # (TB, N, N) f32
        # -1e30 (finite) stands in for -inf; every causal row has >= 1 valid key.
        s = jnp.where(causal, s, -1e30)
        s = s - jnp.max(s, axis=-1, keepdims=True)
        e = jnp.exp(s)
        a = e * pl.reciprocal(jnp.sum(e, axis=-1, keepdims=True), approx=False)
        attn_ref[0, :, h] = a                              # per-head slab store, no stack
        head_o.append(jnp.einsum('bnm,bmd->bnd', a.astype(jnp.bfloat16), v[:, :, sl],
                                 preferred_element_type=jnp.float32))   # (TB, N, hd)

    attn_out = jnp.concatenate(head_o, axis=-1).reshape(TB * N, D)
    y = jnp.dot(attn_out.astype(jnp.bfloat16), proj_w_ref[0],
                preferred_element_type=jnp.float32) + proj_b_ref[0]
    x2 = x2 + y                                           # first residual

    # ---------------- ln_2 + MLP (c_fc -> QuickGELU -> c_proj) ----------------
    xn2 = _layernorm(x2, ln2_w_ref[0], ln2_b_ref[0])
    hmid = jnp.dot(xn2.astype(jnp.bfloat16), fc_w_ref[0],
                   preferred_element_type=jnp.float32) + fc_b_ref[0]   # (TB*N, 4D)
    hmid = hmid * jax.nn.sigmoid(1.702 * hmid)            # QuickGELU
    m = jnp.dot(hmid.astype(jnp.bfloat16), cproj_w_ref[0],
                preferred_element_type=jnp.float32) + cproj_b_ref[0]
    new_x = (x2 + m).reshape(TB, N, D)                    # second residual

    # Last layer: fuse the final `+ ori_x` residual (x_ref still holds the pre-pos tokens).
    @pl.when(l == n_layers - 1)
    def _():
        out_ref[...] = new_x + x_ref[...]

    @pl.when(l < n_layers - 1)
    def _():
        out_ref[...] = new_x


# --------------------------- batch-tile / VMEM sizing ---------------------------
def _vmem_capacity_bytes():
    try:
        return int(pltpu.get_tpu_info().vmem_capacity_bytes)
    except Exception:
        return 64 * 1024 * 1024        # conservative (v7x-sized) fallback


def _min_batch_tiles():
    # v7x has 2 TensorCores per chip; keep >= 2 tiles on the 'parallel' batch axis there.
    try:
        kind = jax.devices()[0].device_kind.lower()
    except Exception:
        kind = ""
    return 2 if ("v7" in kind or "7x" in kind) else 1


def _select_tb(B, N, D, H, vmem_limit):
    """Largest batch tile that fits the scoped-VMEM budget (kernel is weight-streaming bound,
    so bigger TB directly amortizes per-layer weight DMA)."""
    # double-buffered per-layer bf16 weights (+ small f32 biases / LN params)
    w_bytes = 2 * (12 * D * D * 2 + 16 * D * 4)
    # f32 working set per batch row inside one layer step:
    # x carry (in+out), qkv slab, MLP hidden, attention outputs + probabilities.
    row_bytes = 4 * N * (2 * D + 3 * D + 4 * D + 2 * D + H * N)
    avail = vmem_limit - w_bytes - (6 << 20)               # headroom for output buffering
    cap = max(1, int(avail // max(row_bytes, 1)))
    return min(B, cap)


def mit_forward(x, params, tb=None):
    """x: (B, T, D) -> ((B, T+1, D), [attn (B, H, T+1, T+1) per layer])."""
    B, T, D = x.shape
    H = params["num_heads"]
    L = params["qkv_w"].shape[0]
    N = T + 1

    vmem_limit = (_vmem_capacity_bytes() * 3) // 4         # ~48 MiB v7x, ~96 MiB v5e/v6e
    if tb is None:
        TB = _select_tb(B, N, D, H, vmem_limit)
        mt = _min_batch_tiles()
        if mt > 1 and B >= mt:
            TB = min(TB, pl.cdiv(B, mt))
    else:
        TB = tb
    TB = max(1, min(TB, B))
    NB = pl.cdiv(B, TB)
    B_pad = NB * TB                                        # pad B instead of requiring a divisor

    cls = jnp.broadcast_to(params["cls_token"].astype(x.dtype), (B, 1, D))
    x_tok = jnp.concatenate([x, cls], axis=1).astype(jnp.float32)      # (B, N, D)
    if B_pad > B:
        x_tok = jnp.concatenate(
            [x_tok, jnp.zeros((B_pad - B, N, D), jnp.float32)], axis=0)

    def wspec(shape):
        # per-layer stacked parameter: leading L dim selected by the layer grid axis
        return pl.BlockSpec((1,) + shape, lambda b, l, _n=len(shape): (l,) + (0,) * _n)

    kernel = functools.partial(mit_kernel, num_heads=H)
    out_x, attn = pl.pallas_call(
        kernel,
        grid=(NB, L),
        in_specs=[
            pl.BlockSpec((TB, N, D), lambda b, l: (b, 0, 0)),   # tokens+cls, resident over l
            pl.BlockSpec((1, N, D), lambda b, l: (0, 0, 0)),    # positional embedding
            wspec((D, 3 * D)),                                  # qkv weight   (bf16)
            wspec((D, D)),                                      # proj weight  (bf16)
            wspec((1, D)),                                      # proj bias
            wspec((D, 4 * D)),                                  # c_fc weight  (bf16)
            wspec((1, 4 * D)),                                  # c_fc bias
            wspec((4 * D, D)),                                  # c_proj weight(bf16)
            wspec((1, D)),                                      # c_proj bias
            wspec((1, D)), wspec((1, D)),                       # ln_1 w, b
            wspec((1, D)), wspec((1, D)),                       # ln_2 w, b
        ],
        out_specs=[
            pl.BlockSpec((TB, N, D), lambda b, l: (b, 0, 0)),
            # N-wide (unpadded) attention blocks: last two dims equal the full array dims.
            pl.BlockSpec((1, TB, H, N, N), lambda b, l: (l, b, 0, 0, 0)),
        ],
        out_shape=[
            jax.ShapeDtypeStruct((B_pad, N, D), jnp.float32),
            jax.ShapeDtypeStruct((L, B_pad, H, N, N), jnp.float32),
        ],
        compiler_params=pltpu.CompilerParams(
            dimension_semantics=("parallel", "arbitrary"),
            vmem_limit_bytes=int(vmem_limit)),
    )(x_tok, params["pos"],
      params["qkv_w"], params["proj_w"], params["proj_b"],
      params["fc_w"], params["fc_b"], params["cproj_w"], params["cproj_b"],
      params["ln1_w"], params["ln1_b"], params["ln2_w"], params["ln2_b"])

    att_mats = [attn[i, :B] for i in range(L)]             # drop batch padding (lazy slice)
    return out_x[:B], att_mats


def init_mit_params(key, T, embed_dim, layers):
    num_heads = embed_dim // 64
    D = embed_dim
    k_pos, kq, kp, kf, kc = jax.random.split(key, 5)

    def tnorm(k, shape):
        return (0.02 * jax.random.truncated_normal(k, -2.0, 2.0, shape)).astype(jnp.float32)

    return {
        "num_heads": num_heads,
        "cls_token": jnp.zeros((1, 1, D), jnp.float32),
        "pos": tnorm(k_pos, (1, T + 1, D)),
        # linear weights: (in_features, out_features), stacked over layers, bf16 storage
        "qkv_w": tnorm(kq, (layers, D, 3 * D)).astype(jnp.bfloat16),
        "proj_w": tnorm(kp, (layers, D, D)).astype(jnp.bfloat16),
        "proj_b": jnp.zeros((layers, 1, D), jnp.float32),
        "fc_w": tnorm(kf, (layers, D, 4 * D)).astype(jnp.bfloat16),
        "fc_b": jnp.zeros((layers, 1, 4 * D), jnp.float32),
        "cproj_w": tnorm(kc, (layers, 4 * D, D)).astype(jnp.bfloat16),
        "cproj_b": jnp.zeros((layers, 1, D), jnp.float32),
        "ln1_w": jnp.ones((layers, 1, D), jnp.float32),
        "ln1_b": jnp.zeros((layers, 1, D), jnp.float32),
        "ln2_w": jnp.ones((layers, 1, D), jnp.float32),
        "ln2_b": jnp.zeros((layers, 1, D), jnp.float32),
    }


# ------------------------- pure-JAX reference for verification -------------------------
def _ref_forward(x, params):
    B, T, D = x.shape
    H = params["num_heads"]
    hd = D // H
    N = T + 1
    L = params["qkv_w"].shape[0]
    cls = jnp.broadcast_to(params["cls_token"], (B, 1, D))
    x = jnp.concatenate([x, cls], axis=1)
    ori = x
    x = x + params["pos"]
    mask = jnp.tril(jnp.ones((N, N), bool))
    mats = []
    for l in range(L):
        qkv_w = params["qkv_w"][l].astype(jnp.float32)
        proj_w = params["proj_w"][l].astype(jnp.float32)
        fc_w = params["fc_w"][l].astype(jnp.float32)
        cproj_w = params["cproj_w"][l].astype(jnp.float32)
        xn = _layernorm(x, params["ln1_w"][l], params["ln1_b"][l])
        qkv = xn @ qkv_w
        q, k, v = jnp.split(qkv, 3, axis=-1)
        q = q.reshape(B, N, H, hd).transpose(0, 2, 1, 3)
        k = k.reshape(B, N, H, hd).transpose(0, 2, 1, 3)
        v = v.reshape(B, N, H, hd).transpose(0, 2, 1, 3)
        a = jnp.einsum("bhnd,bhmd->bhnm", q, k) * (hd ** -0.5)
        a = jnp.where(mask, a, -jnp.inf)
        a = jax.nn.softmax(a, axis=-1)
        o = jnp.einsum("bhnm,bhmd->bhnd", a, v).transpose(0, 2, 1, 3).reshape(B, N, D)
        x = x + (o @ proj_w + params["proj_b"][l])
        xn2 = _layernorm(x, params["ln2_w"][l], params["ln2_b"][l])
        h = xn2 @ fc_w + params["fc_b"][l]
        h = h * jax.nn.sigmoid(1.702 * h)
        x = x + (h @ cproj_w + params["cproj_b"][l])
        mats.append(a)
    return x + ori, mats


if __name__ == "__main__":
    # N = T+1 = 8 tokens, embed_dim=128 -> 2 heads (head_dim=64), 2 fused layers
    B, T, D, layers = 4, 7, 128, 2
    key = jax.random.PRNGKey(0)
    k_x, k_p = jax.random.split(key)
    x = jax.random.normal(k_x, (B, T, D), jnp.float32)
    params = init_mit_params(k_p, T, D, layers)

    # tb=2 -> grid (2 batch tiles, 2 layers): exercises both grid axes + the VMEM carry
    out, att_mats = mit_forward(x, params, tb=2)
    out = jax.block_until_ready(out)
    att_mats = [jax.block_until_ready(a) for a in att_mats]

    ref_out, ref_mats = _ref_forward(x, params)
    assert out.shape == (B, T + 1, D)
    assert len(att_mats) == layers
    assert att_mats[0].shape == (B, params["num_heads"], T + 1, T + 1)
    assert jnp.allclose(out, ref_out, atol=2e-2, rtol=2e-2), \
        float(jnp.max(jnp.abs(out - ref_out)))
    for a_k, a_r in zip(att_mats, ref_mats):
        assert jnp.allclose(a_k, a_r, atol=2e-2, rtol=2e-2)

    print("KERNEL_OK")
</pallas_src>

<mosaic_0001>
module attributes {stable_mosaic.version = 11 : i64} {
  func.func @mit_kernel(%arg0: i32, %arg1: i32, %arg2: memref<2x8x128xf32, #tpu.memory_space<vmem>>, %arg3: memref<1x8x128xf32, #tpu.memory_space<vmem>>, %arg4: memref<1x128x384xbf16, #tpu.memory_space<vmem>>, %arg5: memref<1x128x128xbf16, #tpu.memory_space<vmem>>, %arg6: memref<1x1x128xf32, #tpu.memory_space<vmem>>, %arg7: memref<1x128x512xbf16, #tpu.memory_space<vmem>>, %arg8: memref<1x1x512xf32, #tpu.memory_space<vmem>>, %arg9: memref<1x512x128xbf16, #tpu.memory_space<vmem>>, %arg10: memref<1x1x128xf32, #tpu.memory_space<vmem>>, %arg11: memref<1x1x128xf32, #tpu.memory_space<vmem>>, %arg12: memref<1x1x128xf32, #tpu.memory_space<vmem>>, %arg13: memref<1x1x128xf32, #tpu.memory_space<vmem>>, %arg14: memref<1x1x128xf32, #tpu.memory_space<vmem>>, %arg15: memref<2x8x128xf32, #tpu.memory_space<vmem>>, %arg16: memref<1x2x2x8x8xf32, #tpu.memory_space<vmem>>) attributes {dimension_semantics = [#tpu.dimension_semantics<parallel>, #tpu.dimension_semantics<arbitrary>], iteration_bounds = array<i64: 2, 2>, scalar_prefetch = 0 : i64, scratch_operands = 0 : i64, tpu.core_type = #tpu.core_type<tc>, window_params = [{transform_indices = @transform_0, window_bounds = array<i64: 2, 8, 128>}, {pipeline_mode = #tpu.pipeline_mode<synchronous>, transform_indices = @transform_1, window_bounds = array<i64: 1, 8, 128>}, {transform_indices = @transform_2, window_bounds = array<i64: 1, 128, 384>}, {transform_indices = @transform_3, window_bounds = array<i64: 1, 128, 128>}, {transform_indices = @transform_4, window_bounds = array<i64: 1, 1, 128>}, {transform_indices = @transform_5, window_bounds = array<i64: 1, 128, 512>}, {transform_indices = @transform_6, window_bounds = array<i64: 1, 1, 512>}, {transform_indices = @transform_7, window_bounds = array<i64: 1, 512, 128>}, {transform_indices = @transform_8, window_bounds = array<i64: 1, 1, 128>}, {transform_indices = @transform_9, window_bounds = array<i64: 1, 1, 128>}, {transform_indices = @transform_10, window_bounds = array<i64: 1, 1, 128>}, {transform_indices = @transform_11, window_bounds = array<i64: 1, 1, 128>}, {transform_indices = @transform_12, window_bounds = array<i64: 1, 1, 128>}, {transform_indices = @transform_13, window_bounds = array<i64: 2, 8, 128>}, {transform_indices = @transform_14, window_bounds = array<i64: 1, 2, 2, 8, 8>}]} {
    %c0_i32 = arith.constant 0 : i32
    %0 = arith.cmpi eq, %arg1, %c0_i32 : i32
    %1 = arith.extui %0 : i1 to i32
    %c0_i32_0 = arith.constant 0 : i32
    %2 = arith.cmpi ne, %1, %c0_i32_0 : i32
    scf.if %2 {
      %c0_75 = arith.constant 0 : index
      %c0_76 = arith.constant 0 : index
      %c0_77 = arith.constant 0 : index
      %166 = vector.load %arg2[%c0_75, %c0_76, %c0_77] : memref<2x8x128xf32, #tpu.memory_space<vmem>>, vector<2x8x128xf32>
      %c0_78 = arith.constant 0 : index
      %c0_79 = arith.constant 0 : index
      %c0_80 = arith.constant 0 : index
      %167 = vector.load %arg3[%c0_78, %c0_79, %c0_80] : memref<1x8x128xf32, #tpu.memory_space<vmem>>, vector<1x8x128xf32>
      %168 = vector.broadcast %167 : vector<1x8x128xf32> to vector<2x8x128xf32>
      %169 = arith.addf %166, %168 : vector<2x8x128xf32>
      %c0_81 = arith.constant 0 : index
      %c0_82 = arith.constant 0 : index
      %c0_83 = arith.constant 0 : index
      %170 = vector.load %arg15[%c0_81, %c0_82, %c0_83] : memref<2x8x128xf32, #tpu.memory_space<vmem>>, vector<2x8x128xf32>
      tpu.vector_store %arg15[%c0_81, %c0_82, %c0_83], %169 {strides = array<i32>} : memref<2x8x128xf32, #tpu.memory_space<vmem>>, vector<2x8x128xf32>,
    } else {
    }
    %c0 = arith.constant 0 : index
    %c0_1 = arith.constant 0 : index
    %c0_2 = arith.constant 0 : index
    %3 = vector.load %arg15[%c0, %c0_1, %c0_2] : memref<2x8x128xf32, #tpu.memory_space<vmem>>, vector<2x8x128xf32>
    %4 = vector.shape_cast %3 : vector<2x8x128xf32> to vector<16x128xf32>
    %c0_3 = arith.constant 0 : index
    %c0_4 = arith.constant 0 : index
    %c0_5 = arith.constant 0 : index
    %5 = vector.load %arg11[%c0_3, %c0_4, %c0_5] : memref<1x1x128xf32, #tpu.memory_space<vmem>>, vector<1x1x128xf32>
    %6 = vector.shape_cast %5 : vector<1x1x128xf32> to vector<1x128xf32>
    %c0_6 = arith.constant 0 : index
    %c0_7 = arith.constant 0 : index
    %c0_8 = arith.constant 0 : index
    %7 = vector.load %arg12[%c0_6, %c0_7, %c0_8] : memref<1x1x128xf32, #tpu.memory_space<vmem>>, vector<1x1x128xf32>
    %8 = vector.shape_cast %7 : vector<1x1x128xf32> to vector<1x128xf32>
    %cst = arith.constant dense<0.000000e+00> : vector<16xf32>
    %9 = vector.multi_reduction <add>, %4, %cst [1] : vector<16x128xf32> to vector<16xf32>
    %10 = vector.shape_cast %9 : vector<16xf32> to vector<16x1xf32>
    %cst_9 = arith.constant 1.280000e+02 : f32
    %11 = vector.broadcast %cst_9 : f32 to vector<16x1xf32>
    %12 = arith.divf %10, %11 : vector<16x1xf32>
    %13 = vector.broadcast %12 : vector<16x1xf32> to vector<16x128xf32>
    %14 = arith.subf %4, %13 : vector<16x128xf32>
    %15 = arith.mulf %14, %14 : vector<16x128xf32>
    %cst_10 = arith.constant dense<0.000000e+00> : vector<16xf32>
    %16 = vector.multi_reduction <add>, %15, %cst_10 [1] : vector<16x128xf32> to vector<16xf32>
    %17 = vector.shape_cast %16 : vector<16xf32> to vector<16x1xf32>
    %cst_11 = arith.constant 1.280000e+02 : f32
    %18 = vector.broadcast %cst_11 : f32 to vector<16x1xf32>
    %19 = arith.divf %17, %18 : vector<16x1xf32>
    %20 = vector.broadcast %12 : vector<16x1xf32> to vector<16x128xf32>
    %21 = arith.subf %4, %20 : vector<16x128xf32>
    %cst_12 = arith.constant 9.99999974E-6 : f32
    %22 = vector.broadcast %cst_12 : f32 to vector<16x1xf32>
    %23 = arith.addf %19, %22 : vector<16x1xf32>
    %24 = math.rsqrt %23 : vector<16x1xf32>
    %25 = vector.broadcast %24 : vector<16x1xf32> to vector<16x128xf32>
    %26 = arith.mulf %21, %25 : vector<16x128xf32>
    %27 = vector.broadcast %6 : vector<1x128xf32> to vector<16x128xf32>
    %28 = arith.mulf %26, %27 : vector<16x128xf32>
    %29 = vector.broadcast %8 : vector<1x128xf32> to vector<16x128xf32>
    %30 = arith.addf %28, %29 : vector<16x128xf32>
    %31 = arith.truncf %30 : vector<16x128xf32> to vector<16x128xbf16>
    %c0_13 = arith.constant 0 : index
    %c0_14 = arith.constant 0 : index
    %c0_15 = arith.constant 0 : index
    %32 = vector.load %arg4[%c0_13, %c0_14, %c0_15] : memref<1x128x384xbf16, #tpu.memory_space<vmem>>, vector<1x128x384xbf16>
    %33 = vector.shape_cast %32 : vector<1x128x384xbf16> to vector<128x384xbf16>
    %cst_16 = arith.constant dense<0.000000e+00> : vector<16x384xf32>
    %34 = tpu.matmul %31, %33, %cst_16 {dimension_numbers = #tpu.dot_dimension_numbers<[1], [0], [0], [1], [0, 0, 1, 1], [], []>} : vector<16x128xbf16>, vector<128x384xbf16>, vector<16x384xf32> -> vector<16x384xf32>
    %35 = vector.extract_strided_slice %34 {offsets = [0, 0], sizes = [16, 128], strides = [1, 1]} : vector<16x384xf32> to vector<16x128xf32>
    %36 = vector.shape_cast %35 : vector<16x128xf32> to vector<2x8x128xf32>
    %37 = arith.truncf %36 : vector<2x8x128xf32> to vector<2x8x128xbf16>
    %38 = vector.extract_strided_slice %34 {offsets = [0, 128], sizes = [16, 128], strides = [1, 1]} : vector<16x384xf32> to vector<16x128xf32>
    %39 = vector.shape_cast %38 : vector<16x128xf32> to vector<2x8x128xf32>
    %40 = arith.truncf %39 : vector<2x8x128xf32> to vector<2x8x128xbf16>
    %41 = vector.extract_strided_slice %34 {offsets = [0, 256], sizes = [16, 128], strides = [1, 1]} : vector<16x384xf32> to vector<16x128xf32>
    %42 = vector.shape_cast %41 : vector<16x128xf32> to vector<2x8x128xf32>
    %43 = arith.truncf %42 : vector<2x8x128xf32> to vector<2x8x128xbf16>
    %44 = tpu.iota {dimensions = array<i32: 0>} : vector<8x8xi32>
    %45 = tpu.iota {dimensions = array<i32: 1>} : vector<8x8xi32>
    %46 = arith.cmpi sle, %45, %44 : vector<8x8xi32>
    %47 = vector.extract_strided_slice %37 {offsets = [0, 0, 0], sizes = [2, 8, 64], strides = [1, 1, 1]} : vector<2x8x128xbf16> to vector<2x8x64xbf16>
    %48 = vector.extract_strided_slice %40 {offsets = [0, 0, 0], sizes = [2, 8, 64], strides = [1, 1, 1]} : vector<2x8x128xbf16> to vector<2x8x64xbf16>
    "tpu.trace_start"() <{level = 10 : i32, message = "bnd,bmd->bnm"}> : () -> ()
    %cst_17 = arith.constant dense<0.000000e+00> : vector<2x8x8xf32>
    %49 = tpu.matmul %47, %48, %cst_17 {dimension_numbers = #tpu.dot_dimension_numbers<[2], [2], [1], [1], [0, 0, 0, 1, 1, 1], [0], [0]>} : vector<2x8x64xbf16>, vector<2x8x64xbf16>, vector<2x8x8xf32> -> vector<2x8x8xf32>
    "tpu.trace_stop"() : () -> ()
    %cst_18 = arith.constant 1.250000e-01 : f32
    %50 = vector.broadcast %cst_18 : f32 to vector<2x8x8xf32>
    %51 = arith.mulf %49, %50 : vector<2x8x8xf32>
    %cst_19 = arith.constant -1.000000e+30 : f32
    %52 = vector.shape_cast %46 : vector<8x8xi1> to vector<1x8x8xi1>
    %53 = vector.broadcast %52 : vector<1x8x8xi1> to vector<2x8x8xi1>
    %54 = vector.broadcast %cst_19 : f32 to vector<2x8x8xf32>
    %55 = arith.select %53, %51, %54 : vector<2x8x8xi1>, vector<2x8x8xf32>
    %cst_20 = arith.constant dense<0xFF800000> : vector<2x8xf32>
    %56 = vector.multi_reduction <maximumf>, %55, %cst_20 [2] : vector<2x8x8xf32> to vector<2x8xf32>
    %57 = vector.shape_cast %56 : vector<2x8xf32> to vector<2x8x1xf32>
    %58 = vector.broadcast %57 : vector<2x8x1xf32> to vector<2x8x8xf32>
    %59 = arith.subf %55, %58 : vector<2x8x8xf32>
    %60 = math.exp %59 : vector<2x8x8xf32>
    %cst_21 = arith.constant dense<0.000000e+00> : vector<2x8xf32>
    %61 = vector.multi_reduction <add>, %60, %cst_21 [2] : vector<2x8x8xf32> to vector<2x8xf32>
    %62 = vector.shape_cast %61 : vector<2x8xf32> to vector<2x8x1xf32>
    %63 = tpu.reciprocal %62 : vector<2x8x1xf32> -> vector<2x8x1xf32>
    %64 = vector.broadcast %63 : vector<2x8x1xf32> to vector<2x8x8xf32>
    %65 = arith.mulf %60, %64 : vector<2x8x8xf32>
    %c0_22 = arith.constant 0 : index
    %c0_23 = arith.constant 0 : index
    %c0_24 = arith.constant 0 : index
    %c0_25 = arith.constant 0 : index
    %c0_26 = arith.constant 0 : index
    %66 = vector.load %arg16[%c0_22, %c0_23, %c0_24, %c0_25, %c0_26] : memref<1x2x2x8x8xf32, #tpu.memory_space<vmem>>, vector<1x2x1x8x8xf32>
    %67 = vector.shape_cast %66 : vector<1x2x1x8x8xf32> to vector<2x8x8xf32>
    %68 = vector.shape_cast %65 : vector<2x8x8xf32> to vector<1x2x1x8x8xf32>
    tpu.vector_store %arg16[%c0_22, %c0_23, %c0_24, %c0_25, %c0_26], %68 {strides = array<i32>} : memref<1x2x2x8x8xf32, #tpu.memory_space<vmem>>, vector<1x2x1x8x8xf32>,
    %69 = arith.truncf %65 : vector<2x8x8xf32> to vector<2x8x8xbf16>
    %70 = vector.extract_strided_slice %43 {offsets = [0, 0, 0], sizes = [2, 8, 64], strides = [1, 1, 1]} : vector<2x8x128xbf16> to vector<2x8x64xbf16>
    "tpu.trace_start"() <{level = 10 : i32, message = "bnm,bmd->bnd"}> : () -> ()
    %cst_27 = arith.constant dense<0.000000e+00> : vector<2x8x64xf32>
    %71 = tpu.matmul %69, %70, %cst_27 {dimension_numbers = #tpu.dot_dimension_numbers<[2], [1], [1], [2], [0, 0, 0, 1, 1, 2], [0], [0]>} : vector<2x8x8xbf16>, vector<2x8x64xbf16>, vector<2x8x64xf32> -> vector<2x8x64xf32>
    "tpu.trace_stop"() : () -> ()
    %72 = vector.extract_strided_slice %37 {offsets = [0, 0, 64], sizes = [2, 8, 64], strides = [1, 1, 1]} : vector<2x8x128xbf16> to vector<2x8x64xbf16>
    %73 = vector.extract_strided_slice %40 {offsets = [0, 0, 64], sizes = [2, 8, 64], strides = [1, 1, 1]} : vector<2x8x128xbf16> to vector<2x8x64xbf16>
    "tpu.trace_start"() <{level = 10 : i32, message = "bnd,bmd->bnm"}> : () -> ()
    %cst_28 = arith.constant dense<0.000000e+00> : vector<2x8x8xf32>
    %74 = tpu.matmul %72, %73, %cst_28 {dimension_numbers = #tpu.dot_dimension_numbers<[2], [2], [1], [1], [0, 0, 0, 1, 1, 1], [0], [0]>} : vector<2x8x64xbf16>, vector<2x8x64xbf16>, vector<2x8x8xf32> -> vector<2x8x8xf32>
    "tpu.trace_stop"() : () -> ()
    %cst_29 = arith.constant 1.250000e-01 : f32
    %75 = vector.broadcast %cst_29 : f32 to vector<2x8x8xf32>
    %76 = arith.mulf %74, %75 : vector<2x8x8xf32>
    %cst_30 = arith.constant -1.000000e+30 : f32
    %77 = vector.shape_cast %46 : vector<8x8xi1> to vector<1x8x8xi1>
    %78 = vector.broadcast %77 : vector<1x8x8xi1> to vector<2x8x8xi1>
    %79 = vector.broadcast %cst_30 : f32 to vector<2x8x8xf32>
    %80 = arith.select %78, %76, %79 : vector<2x8x8xi1>, vector<2x8x8xf32>
    %cst_31 = arith.constant dense<0xFF800000> : vector<2x8xf32>
    %81 = vector.multi_reduction <maximumf>, %80, %cst_31 [2] : vector<2x8x8xf32> to vector<2x8xf32>
    %82 = vector.shape_cast %81 : vector<2x8xf32> to vector<2x8x1xf32>
    %83 = vector.broadcast %82 : vector<2x8x1xf32> to vector<2x8x8xf32>
    %84 = arith.subf %80, %83 : vector<2x8x8xf32>
    %85 = math.exp %84 : vector<2x8x8xf32>
    %cst_32 = arith.constant dense<0.000000e+00> : vector<2x8xf32>
    %86 = vector.multi_reduction <add>, %85, %cst_32 [2] : vector<2x8x8xf32> to vector<2x8xf32>
    %87 = vector.shape_cast %86 : vector<2x8xf32> to vector<2x8x1xf32>
    %88 = tpu.reciprocal %87 : vector<2x8x1xf32> -> vector<2x8x1xf32>
    %89 = vector.broadcast %88 : vector<2x8x1xf32> to vector<2x8x8xf32>
    %90 = arith.mulf %85, %89 : vector<2x8x8xf32>
    %c0_33 = arith.constant 0 : index
    %c0_34 = arith.constant 0 : index
    %c1 = arith.constant 1 : index
    %c0_35 = arith.constant 0 : index
    %c0_36 = arith.constant 0 : index
    %91 = vector.load %arg16[%c0_33, %c0_34, %c1, %c0_35, %c0_36] : memref<1x2x2x8x8xf32, #tpu.memory_space<vmem>>, vector<1x2x1x8x8xf32>
    %92 = vector.shape_cast %91 : vector<1x2x1x8x8xf32> to vector<2x8x8xf32>
    %93 = vector.shape_cast %90 : vector<2x8x8xf32> to vector<1x2x1x8x8xf32>
    tpu.vector_store %arg16[%c0_33, %c0_34, %c1, %c0_35, %c0_36], %93 {strides = array<i32>} : memref<1x2x2x8x8xf32, #tpu.memory_space<vmem>>, vector<1x2x1x8x8xf32>,
    %94 = arith.truncf %90 : vector<2x8x8xf32> to vector<2x8x8xbf16>
    %95 = vector.extract_strided_slice %43 {offsets = [0, 0, 64], sizes = [2, 8, 64], strides = [1, 1, 1]} : vector<2x8x128xbf16> to vector<2x8x64xbf16>
    "tpu.trace_start"() <{level = 10 : i32, message = "bnm,bmd->bnd"}> : () -> ()
    %cst_37 = arith.constant dense<0.000000e+00> : vector<2x8x64xf32>
    %96 = tpu.matmul %94, %95, %cst_37 {dimension_numbers = #tpu.dot_dimension_numbers<[2], [1], [1], [2], [0, 0, 0, 1, 1, 2], [0], [0]>} : vector<2x8x8xbf16>, vector<2x8x64xbf16>, vector<2x8x64xf32> -> vector<2x8x64xf32>
    "tpu.trace_stop"() : () -> ()
    %97 = tpu.concatenate %71, %96 in 2 : vector<2x8x64xf32>, vector<2x8x64xf32> -> vector<2x8x128xf32>
    %98 = vector.shape_cast %97 : vector<2x8x128xf32> to vector<16x128xf32>
    %99 = arith.truncf %98 : vector<16x128xf32> to vector<16x128xbf16>
    %c0_38 = arith.constant 0 : index
    %c0_39 = arith.constant 0 : index
    %c0_40 = arith.constant 0 : index
    %100 = vector.load %arg5[%c0_38, %c0_39, %c0_40] : memref<1x128x128xbf16, #tpu.memory_space<vmem>>, vector<1x128x128xbf16>
    %101 = vector.shape_cast %100 : vector<1x128x128xbf16> to vector<128x128xbf16>
    %cst_41 = arith.constant dense<0.000000e+00> : vector<16x128xf32>
    %102 = tpu.matmul %99, %101, %cst_41 {dimension_numbers = #tpu.dot_dimension_numbers<[1], [0], [0], [1], [0, 0, 1, 1], [], []>} : vector<16x128xbf16>, vector<128x128xbf16>, vector<16x128xf32> -> vector<16x128xf32>
    %c0_42 = arith.constant 0 : index
    %c0_43 = arith.constant 0 : index
    %c0_44 = arith.constant 0 : index
    %103 = vector.load %arg6[%c0_42, %c0_43, %c0_44] : memref<1x1x128xf32, #tpu.memory_space<vmem>>, vector<1x1x128xf32>
    %104 = vector.shape_cast %103 : vector<1x1x128xf32> to vector<1x128xf32>
    %105 = vector.broadcast %104 : vector<1x128xf32> to vector<16x128xf32>
    %106 = arith.addf %102, %105 : vector<16x128xf32>
    %107 = arith.addf %4, %106 : vector<16x128xf32>
    %c0_45 = arith.constant 0 : index
    %c0_46 = arith.constant 0 : index
    %c0_47 = arith.constant 0 : index
    %108 = vector.load %arg13[%c0_45, %c0_46, %c0_47] : memref<1x1x128xf32, #tpu.memory_space<vmem>>, vector<1x1x128xf32>
    %109 = vector.shape_cast %108 : vector<1x1x128xf32> to vector<1x128xf32>
    %c0_48 = arith.constant 0 : index
    %c0_49 = arith.constant 0 : index
    %c0_50 = arith.constant 0 : index
    %110 = vector.load %arg14[%c0_48, %c0_49, %c0_50] : memref<1x1x128xf32, #tpu.memory_space<vmem>>, vector<1x1x128xf32>
    %111 = vector.shape_cast %110 : vector<1x1x128xf32> to vector<1x128xf32>
    %cst_51 = arith.constant dense<0.000000e+00> : vector<16xf32>
    %112 = vector.multi_reduction <add>, %107, %cst_51 [1] : vector<16x128xf32> to vector<16xf32>
    %113 = vector.shape_cast %112 : vector<16xf32> to vector<16x1xf32>
    %cst_52 = arith.constant 1.280000e+02 : f32
    %114 = vector.broadcast %cst_52 : f32 to vector<16x1xf32>
    %115 = arith.divf %113, %114 : vector<16x1xf32>
    %116 = vector.broadcast %115 : vector<16x1xf32> to vector<16x128xf32>
    %117 = arith.subf %107, %116 : vector<16x128xf32>
    %118 = arith.mulf %117, %117 : vector<16x128xf32>
    %cst_53 = arith.constant dense<0.000000e+00> : vector<16xf32>
    %119 = vector.multi_reduction <add>, %118, %cst_53 [1] : vector<16x128xf32> to vector<16xf32>
    %120 = vector.shape_cast %119 : vector<16xf32> to vector<16x1xf32>
    %cst_54 = arith.constant 1.280000e+02 : f32
    %121 = vector.broadcast %cst_54 : f32 to vector<16x1xf32>
    %122 = arith.divf %120, %121 : vector<16x1xf32>
    %123 = vector.broadcast %115 : vector<16x1xf32> to vector<16x128xf32>
    %124 = arith.subf %107, %123 : vector<16x128xf32>
    %cst_55 = arith.constant 9.99999974E-6 : f32
    %125 = vector.broadcast %cst_55 : f32 to vector<16x1xf32>
    %126 = arith.addf %122, %125 : vector<16x1xf32>
    %127 = math.rsqrt %126 : vector<16x1xf32>
    %128 = vector.broadcast %127 : vector<16x1xf32> to vector<16x128xf32>
    %129 = arith.mulf %124, %128 : vector<16x128xf32>
    %130 = vector.broadcast %109 : vector<1x128xf32> to vector<16x128xf32>
    %131 = arith.mulf %129, %130 : vector<16x128xf32>
    %132 = vector.broadcast %111 : vector<1x128xf32> to vector<16x128xf32>
    %133 = arith.addf %131, %132 : vector<16x128xf32>
    %134 = arith.truncf %133 : vector<16x128xf32> to vector<16x128xbf16>
    %c0_56 = arith.constant 0 : index
    %c0_57 = arith.constant 0 : index
    %c0_58 = arith.constant 0 : index
    %135 = vector.load %arg7[%c0_56, %c0_57, %c0_58] : memref<1x128x512xbf16, #tpu.memory_space<vmem>>, vector<1x128x512xbf16>
    %136 = vector.shape_cast %135 : vector<1x128x512xbf16> to vector<128x512xbf16>
    %cst_59 = arith.constant dense<0.000000e+00> : vector<16x512xf32>
    %137 = tpu.matmul %134, %136, %cst_59 {dimension_numbers = #tpu.dot_dimension_numbers<[1], [0], [0], [1], [0, 0, 1, 1], [], []>} : vector<16x128xbf16>, vector<128x512xbf16>, vector<16x512xf32> -> vector<16x512xf32>
    %c0_60 = arith.constant 0 : index
    %c0_61 = arith.constant 0 : index
    %c0_62 = arith.constant 0 : index
    %138 = vector.load %arg8[%c0_60, %c0_61, %c0_62] : memref<1x1x512xf32, #tpu.memory_space<vmem>>, vector<1x1x512xf32>
    %139 = vector.shape_cast %138 : vector<1x1x512xf32> to vector<1x512xf32>
    %140 = vector.broadcast %139 : vector<1x512xf32> to vector<16x512xf32>
    %141 = arith.addf %137, %140 : vector<16x512xf32>
    %cst_63 = arith.constant 1.702000e+00 : f32
    %142 = vector.broadcast %cst_63 : f32 to vector<16x512xf32>
    %143 = arith.mulf %142, %141 : vector<16x512xf32>
    %144 = arith.negf %143 : vector<16x512xf32>
    %145 = math.exp %144 : vector<16x512xf32>
    %cst_64 = arith.constant 1.000000e+00 : f32
    %146 = vector.broadcast %cst_64 : f32 to vector<16x512xf32>
    %147 = arith.addf %146, %145 : vector<16x512xf32>
    %148 = arith.divf %146, %147 : vector<16x512xf32>
    %149 = arith.mulf %141, %148 : vector<16x512xf32>
    %150 = arith.truncf %149 : vector<16x512xf32> to vector<16x512xbf16>
    %c0_65 = arith.constant 0 : index
    %c0_66 = arith.constant 0 : index
    %c0_67 = arith.constant 0 : index
    %151 = vector.load %arg9[%c0_65, %c0_66, %c0_67] : memref<1x512x128xbf16, #tpu.memory_space<vmem>>, vector<1x512x128xbf16>
    %152 = vector.shape_cast %151 : vector<1x512x128xbf16> to vector<512x128xbf16>
    %cst_68 = arith.constant dense<0.000000e+00> : vector<16x128xf32>
    %153 = tpu.matmul %150, %152, %cst_68 {dimension_numbers = #tpu.dot_dimension_numbers<[1], [0], [0], [1], [0, 0, 1, 1], [], []>} : vector<16x512xbf16>, vector<512x128xbf16>, vector<16x128xf32> -> vector<16x128xf32>
    %c0_69 = arith.constant 0 : index
    %c0_70 = arith.constant 0 : index
    %c0_71 = arith.constant 0 : index
    %154 = vector.load %arg10[%c0_69, %c0_70, %c0_71] : memref<1x1x128xf32, #tpu.memory_space<vmem>>, vector<1x1x128xf32>
    %155 = vector.shape_cast %154 : vector<1x1x128xf32> to vector<1x128xf32>
    %156 = vector.broadcast %155 : vector<1x128xf32> to vector<16x128xf32>
    %157 = arith.addf %153, %156 : vector<16x128xf32>
    %158 = arith.addf %107, %157 : vector<16x128xf32>
    %159 = vector.shape_cast %158 : vector<16x128xf32> to vector<2x8x128xf32>
    %c1_i32 = arith.constant 1 : i32
    %160 = arith.cmpi eq, %arg1, %c1_i32 : i32
    %161 = arith.extui %160 : i1 to i32
    %c0_i32_72 = arith.constant 0 : i32
    %162 = arith.cmpi ne, %161, %c0_i32_72 : i32
    scf.if %162 {
      %c0_75 = arith.constant 0 : index
      %c0_76 = arith.constant 0 : index
      %c0_77 = arith.constant 0 : index
      %166 = vector.load %arg2[%c0_75, %c0_76, %c0_77] : memref<2x8x128xf32, #tpu.memory_space<vmem>>, vector<2x8x128xf32>
      %167 = arith.addf %159, %166 : vector<2x8x128xf32>
      %c0_78 = arith.constant 0 : index
      %c0_79 = arith.constant 0 : index
      %c0_80 = arith.constant 0 : index
      %168 = vector.load %arg15[%c0_78, %c0_79, %c0_80] : memref<2x8x128xf32, #tpu.memory_space<vmem>>, vector<2x8x128xf32>
      tpu.vector_store %arg15[%c0_78, %c0_79, %c0_80], %167 {strides = array<i32>} : memref<2x8x128xf32, #tpu.memory_space<vmem>>, vector<2x8x128xf32>,
    } else {
    }
    %c1_i32_73 = arith.constant 1 : i32
    %163 = arith.cmpi slt, %arg1, %c1_i32_73 : i32
    %164 = arith.extui %163 : i1 to i32
    %c0_i32_74 = arith.constant 0 : i32
    %165 = arith.cmpi ne, %164, %c0_i32_74 : i32
    scf.if %165 {
      %c0_75 = arith.constant 0 : index
      %c0_76 = arith.constant 0 : index
      %c0_77 = arith.constant 0 : index
      %166 = vector.load %arg15[%c0_75, %c0_76, %c0_77] : memref<2x8x128xf32, #tpu.memory_space<vmem>>, vector<2x8x128xf32>
      tpu.vector_store %arg15[%c0_75, %c0_76, %c0_77], %159 {strides = array<i32>} : memref<2x8x128xf32, #tpu.memory_space<vmem>>, vector<2x8x128xf32>,
    } else {
    }
    return
  }
  func.func @transform_0(%arg0: i32, %arg1: i32) -> (i32, i32, i32) {
    %c0_i32 = arith.constant 0 : i32
    %c0_i32_0 = arith.constant 0 : i32
    %c0_i32_1 = arith.constant 0 : i32
    return %arg0, %c0_i32, %c0_i32_0 : i32, i32, i32
  }
  func.func @transform_1(%arg0: i32, %arg1: i32) -> (i32, i32, i32) {
    %c0_i32 = arith.constant 0 : i32
    %c0_i32_0 = arith.constant 0 : i32
    %c0_i32_1 = arith.constant 0 : i32
    %c0_i32_2 = arith.constant 0 : i32
    return %c0_i32, %c0_i32_0, %c0_i32_1 : i32, i32, i32
  }
  func.func @transform_2(%arg0: i32, %arg1: i32) -> (i32, i32, i32) {
    %c0_i32 = arith.constant 0 : i32
    %c0_i32_0 = arith.constant 0 : i32
    %c0_i32_1 = arith.constant 0 : i32
    return %arg1, %c0_i32, %c0_i32_0 : i32, i32, i32
  }
  func.func @transform_3(%arg0: i32, %arg1: i32) -> (i32, i32, i32) {
    %c0_i32 = arith.constant 0 : i32
    %c0_i32_0 = arith.constant 0 : i32
    %c0_i32_1 = arith.constant 0 : i32
    return %arg1, %c0_i32, %c0_i32_0 : i32, i32, i32
  }
  func.func @transform_4(%arg0: i32, %arg1: i32) -> (i32, i32, i32) {
    %c0_i32 = arith.constant 0 : i32
    %c0_i32_0 = arith.constant 0 : i32
    %c0_i32_1 = arith.constant 0 : i32
    return %arg1, %c0_i32, %c0_i32_0 : i32, i32, i32
  }
  func.func @transform_5(%arg0: i32, %arg1: i32) -> (i32, i32, i32) {
    %c0_i32 = arith.constant 0 : i32
    %c0_i32_0 = arith.constant 0 : i32
    %c0_i32_1 = arith.constant 0 : i32
    return %arg1, %c0_i32, %c0_i32_0 : i32, i32, i32
  }
  func.func @transform_6(%arg0: i32, %arg1: i32) -> (i32, i32, i32) {
    %c0_i32 = arith.constant 0 : i32
    %c0_i32_0 = arith.constant 0 : i32
    %c0_i32_1 = arith.constant 0 : i32
    return %arg1, %c0_i32, %c0_i32_0 : i32, i32, i32
  }
  func.func @transform_7(%arg0: i32, %arg1: i32) -> (i32, i32, i32) {
    %c0_i32 = arith.constant 0 : i32
    %c0_i32_0 = arith.constant 0 : i32
    %c0_i32_1 = arith.constant 0 : i32
    return %arg1, %c0_i32, %c0_i32_0 : i32, i32, i32
  }
  func.func @transform_8(%arg0: i32, %arg1: i32) -> (i32, i32, i32) {
    %c0_i32 = arith.constant 0 : i32
    %c0_i32_0 = arith.constant 0 : i32
    %c0_i32_1 = arith.constant 0 : i32
    return %arg1, %c0_i32, %c0_i32_0 : i32, i32, i32
  }
  func.func @transform_9(%arg0: i32, %arg1: i32) -> (i32, i32, i32) {
    %c0_i32 = arith.constant 0 : i32
    %c0_i32_0 = arith.constant 0 : i32
    %c0_i32_1 = arith.constant 0 : i32
    return %arg1, %c0_i32, %c0_i32_0 : i32, i32, i32
  }
  func.func @transform_10(%arg0: i32, %arg1: i32) -> (i32, i32, i32) {
    %c0_i32 = arith.constant 0 : i32
    %c0_i32_0 = arith.constant 0 : i32
    %c0_i32_1 = arith.constant 0 : i32
    return %arg1, %c0_i32, %c0_i32_0 : i32, i32, i32
  }
  func.func @transform_11(%arg0: i32, %arg1: i32) -> (i32, i32, i32) {
    %c0_i32 = arith.constant 0 : i32
    %c0_i32_0 = arith.constant 0 : i32
    %c0_i32_1 = arith.constant 0 : i32
    return %arg1, %c0_i32, %c0_i32_0 : i32, i32, i32
  }
  func.func @transform_12(%arg0: i32, %arg1: i32) -> (i32, i32, i32) {
    %c0_i32 = arith.constant 0 : i32
    %c0_i32_0 = arith.constant 0 : i32
    %c0_i32_1 = arith.constant 0 : i32
    return %arg1, %c0_i32, %c0_i32_0 : i32, i32, i32
  }
  func.func @transform_13(%arg0: i32, %arg1: i32) -> (i32, i32, i32) {
    %c0_i32 = arith.constant 0 : i32
    %c0_i32_0 = arith.constant 0 : i32
    %c0_i32_1 = arith.constant 0 : i32
    return %arg0, %c0_i32, %c0_i32_0 : i32, i32, i32
  }
  func.func @transform_14(%arg0: i32, %arg1: i32) -> (i32, i32, i32, i32, i32) {
    %c0_i32 = arith.constant 0 : i32
    %c0_i32_0 = arith.constant 0 : i32
    %c0_i32_1 = arith.constant 0 : i32
    %c0_i32_2 = arith.constant 0 : i32
    return %arg1, %arg0, %c0_i32, %c0_i32_0, %c0_i32_1 : i32, i32, i32, i32, i32
  }
}

</mosaic_0001>

<bundles_post_ra>
// kernel: tpu_custom_call.1
= control target key start
LH: loop header
LB: loop body
LE: loop exit
PB: predicated region body
PF: predicated region fallthrough
CT: control target
= control target key end

     0   :  { %s4831_s0 = inlined_call_operand.hbm [shape: f32[4,8,128], index: 0, kind: input, shape index: {}]   ;;  %s4832_s1 = inlined_call_operand.hbm [shape: f32[1,8,128], index: 1, kind: input, shape index: {}]   ;;  %s4833_s2 = inlined_call_operand.hbm [shape: bf16[2,128,384], index: 2, kind: input, shape index: {}]   ;;  %s4834_s3 = inlined_call_operand.hbm [shape: bf16[2,128,128], index: 3, kind: input, shape index: {}]   ;;  %s4835_s4 = inlined_call_operand.vmem [shape: f32[2,1,128], index: 4, kind: input, shape index: {}]   ;;  %s4836_s5 = inlined_call_operand.hbm [shape: bf16[2,128,512], index: 5, kind: input, shape index: {}]   ;;  %s4837_s6 = inlined_call_operand.vmem [shape: f32[2,1,512], index: 6, kind: input, shape index: {}]   ;;  %s4838_s7 = inlined_call_operand.hbm [shape: bf16[2,512,128], index: 7, kind: input, shape index: {}]   ;;  %s4839_s8 = inlined_call_operand.vmem [shape: f32[2,1,128], index: 8, kind: input, shape index: {}]   ;;  %s4840_s9 = inlined_call_operand.vmem [shape: f32[2,1,128], index: 9, kind: input, shape index: {}]   ;;  %s4841_s10 = inlined_call_operand.vmem [shape: f32[2,1,128], index: 10, kind: input, shape index: {}]   ;;  %s4842_s11 = inlined_call_operand.vmem [shape: f32[2,1,128], index: 11, kind: input, shape index: {}]   ;;  %s4843_s12 = inlined_call_operand.vmem [shape: f32[2,1,128], index: 12, kind: input, shape index: {}]   ;;  %s4844_s13 = inlined_call_operand.hbm [shape: f32[4,8,128], index: 13, kind: output, shape index: {0}]   ;;  %s4845_s14 = inlined_call_operand.hbm [shape: f32[2,4,2,8,8], index: 14, kind: output, shape index: {1}]  }
   0x1   :  { %4887 = sst [smem:[#allocation40_spill]] %s4831_s0 }
   0x2   :  { %4888 = sst [smem:[#allocation41_spill]] %s4832_s1 }
   0x3   :  { %4889 = sst [smem:[#allocation42_spill]] %s4833_s2 }
   0x4   :  { %4890 = sst [smem:[#allocation43_spill]] %s4834_s3 }
   0x5   :  { %4891 = sst [smem:[#allocation44_spill]] %s4835_s4 }
   0x6   :  { %4892 = sst [smem:[#allocation45_spill]] %s4836_s5 }
   0x7   :  { %4893 = sst [smem:[#allocation46_spill]] %s4837_s6 }
   0x8   :  { %4894 = sst [smem:[#allocation47_spill]] %s4838_s7 }
   0x9   :  { %4895 = sst [smem:[#allocation48_spill]] %s4839_s8 }
   0xa   :  { %4896 = sst [smem:[#allocation49_spill]] %s4840_s9 }
   0xb   :  { %4897 = sst [smem:[#allocation50_spill]] %s4841_s10 }
   0xc   :  { %4898 = sst [smem:[#allocation51_spill]] %s4842_s11 }
   0xd   :  { %4899 = sst [smem:[#allocation52_spill]] %s4843_s12 }
   0xe   :  { %4900 = sst [smem:[#allocation53_spill]] %s4844_s13 }
   0xf   :  { %4901 = sst [smem:[#allocation54_spill]] %s4845_s14 }
  0x10   :  { %20 = vsyncpa [#allocation3], 0 }
  0x11   :  { %22 = vsyncpa [#allocation3 + $0x1], 0 }
  0x12   :  { %23 = vsyncpa [#allocation6], 0 }
  0x13   :  { %24 = vsyncpa [#allocation4], 0 }
  0x14   :  { %26 = vsyncpa [#allocation4 + $0x1], 0 }
  0x15   :  { %27 = vsyncpa [#allocation13], 0 }
  0x16   :  { %29 = vsyncpa [#allocation13 + $0x1], 0  ;;  %s3904_s29 = smov 0   ;;  %s3906_s30 = smov 0  }
  0x17   :  { %s3908_s15 = smov 0   ;;  %s3910_s16 = smov 0  }
  0x18   :  { %s3912_s17 = smov 0   ;;  %s3914_s18 = smov 0  }
  0x19   :  { %s3916_s19 = smov 0   ;;  %s3918_s20 = smov 0  }
  0x1a   :  { %s3920_s21 = smov 0   ;;  %s3922_s22 = smov 0  }
  0x1b   :  { %s3924_s23 = smov 0   ;;  %s3926_s24 = smov 0  }
  0x1c   :  { %s3928_s25 = smov 0   ;;  %s3930_s26 = smov 0  }
  0x1d LB: > { %4902 = sst [smem:[#allocation19_spill]] %s3753_s29  ;;  %s44_s27 = sadd.s32 1, %s3797_s24  ;;  %s3805_s26 = sphi %s3930_s26, %s35_s26   ;;  %s3801_s25 = sphi %s3928_s25, %s5008_s25   ;;  %s3797_s24 = sphi %s3926_s24, %s5007_s24   ;;  %s3793_s23 = sphi %s3924_s23, %s5006_s23   ;;  %s3789_s22 = sphi %s3922_s22, %s5005_s22   ;;  %s3785_s21 = sphi %s3920_s21, %s5004_s21   ;;  %s3781_s20 = sphi %s3918_s20, %s5010_s20   ;;  %s3777_s19 = sphi %s3916_s19, %s5009_s19   ;;  %s3773_s18 = sphi %s3914_s18, %s5002_s18   ;;  %s3769_s17 = sphi %s3912_s17, %s5001_s17   ;;  %s3765_s16 = sphi %s3910_s16, %s5000_s16   ;;  %s3761_s15 = sphi %s3908_s15, %s4999_s15   ;;  %s3757_s30 = sphi %s3906_s30, %s4998_s30   ;;  %s3753_s29 = sphi %s3904_s29, %s4997_s29  }
  0x1e   : > { %4903 = sst [smem:[#allocation20_spill]] %s3757_s30  ;;  %s47_s28 = sadd.s32 1, %s3801_s25 }
  0x1f   : > { %4904 = sst [smem:[#allocation21_spill]] %s3761_s15  ;;  %p45_p0 = scmp.ge.s32.totalorder %s44_s27, 2 }
  0x20   : > { %4905 = sst [smem:[#allocation22_spill]] %s3769_s17  ;;  %s54_s14 = sadd.s32 1, %s3785_s21 }
  0x21   : > { %4906 = sst [smem:[#allocation23_spill]] %s3773_s18  ;;  %p4854_p1 = scmp.ne.s32.totalorder %s3785_s21, %s3781_s20 }
  0x22   : > { %4907 = sst [smem:[#allocation24_spill]] %s3777_s19  ;;  %p4856_p2 = scmp.eq.s32.totalorder %s3805_s26, 0 }
  0x23   : > { %4908 = sst [smem:[#allocation25_spill]] %s3785_s21  ;;  %s5012_s27 = smov (%p45_p0, %s44_s27), 0 }
  0x24   : > { %4909 = sst [smem:[#allocation26_spill]] %s3789_s22  ;;  %s5014_s28 = smov (!%p45_p0, %s47_s28), %s3801_s25 }
  0x25   : > { %4910 = sst [smem:[#allocation27_spill]] %s3793_s23  ;;  %p3988_p3 = por %p4856_p2, %p4854_p1 }
  0x26   : > { %4911 = sst [smem:[#allocation28_spill]] %s3797_s24  ;;  %s3994_s23 = ssub.s32 %s3797_s24, %s5012_s27 }
  0x27   : > { %4912 = sst [smem:[#allocation29_spill]] %s3801_s25  ;;  %p49_p4 = scmp.ge.s32.totalorder %s5014_s28, 2 }
  0x28   : > { %4913 = sst [smem:[#allocation30_spill]] %s3805_s26  ;;  %p4855_p6 = scmp.lt.s32.totalorder %s3805_s26, 4 }
  0x29   : > { %4914 = sst [smem:[#allocation31_spill]] %s5012_s27  ;;  %s5016_s28 = smov (%p49_p4, %s5014_s28), 0 }
  0x2a   : > { %4916 = sst [smem:[#allocation32_spill]] %s5016_s28  ;;  %s463_s12 = sand.u32 1, %s3805_s26  }
  0x2b   : > { %s465_s11 = sand.u32 1, %s3785_s21   ;;  %s51_s10 = ssub.s32 %s3801_s25, %s5016_s28 }
  0x2c   : > { %p52_p7 = scmp.eq.s32.totalorder %s51_s10, 0  ;;  %s412_s9 = sor.u32 %s3994_s23, %s51_s10 }
  0x2d   : > { %p4005_p8 = scmp.eq.s32.totalorder %s412_s9, 0  ;;  %s2754_s27 = sshll.u32 %s465_s11, 4 }
  0x2e   : > { %s4010_s6 = scalar_select %p52_p7, %s3785_s21, %s54_s14  }
  0x2f   : > { %s4917_s8 = scalar_select %p4005_p8, 1, 0 }
  0x30   : > { %4918 = sst [smem:[#allocation33_spill]] %s4010_s6  ;;  %s2909_s4 = sshll.u32 %s3801_s25, 8 }
  0x31   : > { %s4919_s0 = sld [smem:[#allocation40_spill]]  ;;  %s467_s28 = scalar_lea.vmem [#allocation2], %s2754_s27 }
  0x32   : > { %s474_s29 = sshll.u32 %s467_s28, 4  ;;  %p4024_p9 = pnand %p4855_p6, %p3988_p3  ;;  %s4018_s29 = int_to_ptr.vmem [resolvable:$true] %s474_s29 }
  0x33   : > { %s4028_s10 = scalar_lea.sflag [#allocation3], %s463_s12 }
  0x34   : > { %p3443_p11 = pneg %p4024_p9 }
  0x37   : > { %s4016_s7 = scalar_lea.hbm %s4919_s0, %s2909_s4  ;;  %s3446_s13 = scalar_lea.hbm %s4919_s0, 512 }
  0x38   : > { %s3441_s1 = scalar_lea.hbm %s4016_s7, 256  ;;  %p3447_p0 = scmp.lt.u32.totalorder %s4016_s7, %s4919_s0 }
  0x39   : > { %p3442_p10 = scmp.ne.s32.totalorder %s4016_s7, %s3441_s1  ;;  %p3448_p3 = scmp.lt.u32.totalorder %s3446_s13, %s3441_s1 }
  0x3a   : > { %p3450_p7 = scmp.lt.u32.totalorder %s3441_s1, %s4016_s7 }
  0x3b   : > { %p3444_p12 = pnand %p3443_p11, %p3442_p10  ;;  %p3449_p4 = por %p3448_p3, %p3447_p0 }
  0x3d   : > { %p3445_p13 = pneg %p3444_p12  ;;  %p3451_p1 = por %p3450_p7, %p3449_p4 }
  0x3f   : > { %p3452_p6 = pnand %p3451_p1, %p3445_p13 }
  0x41   : > { %3455 = shalt.err (!%p3452_p6)
}
  0x42   : > { %s3456_s12 = scalar_lea.vmem %s4018_s29, 256  ;;  %s3807_s27 = smov [#allocation2]  }
  0x43   : > { %p3457_p10 = scmp.ne.s32.totalorder %s4018_s29, %s3456_s12  ;;  %s3461_s28 = sshll.u32 %s3807_s27, 4  ;;  %s3462_s28 = int_to_ptr.vmem [resolvable:$false] %s3461_s28 }
  0x44   : > { %s3463_s4 = scalar_lea.vmem %s3462_s28, 512  ;;  %p3464_p5 = scmp.lt.s32.totalorder %s4018_s29, %s3462_s28 }
  0x45   : > { %p3459_p12 = pnand %p3457_p10, %p3443_p11  ;;  %p3465_p0 = scmp.lt.s32.totalorder %s3463_s4, %s3456_s12 }
  0x47   : > { %p3460_p2 = pneg %p3459_p12  ;;  %p3466_p3 = por %p3465_p0, %p3464_p5 }
  0x49   : > { %p3467_p4 = pnand %p3466_p3, %p3460_p2 }
  0x4b   : > { %3470 = shalt.err (!%p3467_p4)
}
  0x4c   : > { %s3808_s1 = smov 128   ;;  %s3809_s11 = smov 8  }
  0x4d   : > { %3109 = dma.hbm_to_vmem [thread:$0]  (!%p4024_p9), %s4016_s7, 256, %s4018_s29, %s4028_s10, %s3808_s1, %s3808_s1, %s3809_s11  }
  0x4e   : > { %s3082_s13 = smul.u32 3072, %s3797_s24  ;;  %s101_s14 = sadd.s32 1, %s3773_s18 }
  0x4f   : > { %p108_p1 = scmp.ne.s32.totalorder %s3773_s18, %s3769_s17  ;;  %p4921_p2 = scmp.eq.s32.totalorder %s3994_s23, 0 }
  0x50   : > { %p4923_p5 = scmp.eq.s32.totalorder %s3805_s26, 0  ;;  %s4068_s12 = sand.u32 1, %s3773_s18  }
  0x51   : > { %s4063_s22 = scalar_select %p4921_p2, %s3773_s18, %s101_s14  }
  0x52   : > { %p110_p6 = por %p108_p1, %p4923_p5  ;;  %s3081_s27 = smul.u32 192, %s4068_s12 }
  0x53   : > { %4922 = sst [smem:[#allocation34_spill]] %s4063_s22  ;;  %s4924_s2 = sld [smem:[#allocation42_spill]] }
  0x54   : > { %p4925_p11 = scmp.lt.s32.totalorder %s3805_s26, 4  ;;  %s488_s29 = scalar_lea.vmem [#allocation7], %s3081_s27 }
  0x55   : > { %s495_s23 = sshll.u32 %s488_s29, 4  ;;  %s4082_s23 = int_to_ptr.vmem [resolvable:$true] %s495_s23 }
  0x56   : > { %p4078_p9 = pnand %p4925_p11, %p110_p6 }
  0x58   : > { %p4089_p7 = pneg %p4078_p9 }
  0x59   : > { %s4074_s0 = scalar_lea.hbm %s4924_s2, %s3082_s13  ;;  %s3476_s28 = scalar_lea.hbm %s4924_s2, 6144 }
  0x5a   : > { %s3471_s1 = scalar_lea.hbm %s4074_s0, 3072  ;;  %p3477_p0 = scmp.lt.u32.totalorder %s4074_s0, %s4924_s2 }
  0x5b   : > { %p3472_p13 = scmp.ne.s32.totalorder %s4074_s0, %s3471_s1  ;;  %p3478_p3 = scmp.lt.u32.totalorder %s3476_s28, %s3471_s1 }
  0x5c   : > { %p3480_p1 = scmp.lt.u32.totalorder %s3471_s1, %s4074_s0 }
  0x5d   : > { %p3474_p10 = pnand %p4089_p7, %p3472_p13  ;;  %p3479_p4 = por %p3478_p3, %p3477_p0 }
  0x5f   : > { %p3475_p12 = pneg %p3474_p10  ;;  %p3481_p2 = por %p3480_p1, %p3479_p4 }
  0x61   : > { %p3482_p5 = pnand %p3481_p2, %p3475_p12 }
  0x63   : > { %3485 = shalt.err (!%p3482_p5)
}
  0x64   : > { %s3486_s29 = scalar_lea.vmem %s4082_s23, 3072  ;;  %s3810_s13 = smov [#allocation7]  }
  0x65   : > { %p3487_p6 = scmp.ne.s32.totalorder %s4082_s23, %s3486_s29  ;;  %s3491_s14 = sshll.u32 %s3810_s13, 4  ;;  %s3492_s14 = int_to_ptr.vmem [resolvable:$false] %s3491_s14 }
  0x66   : > { %s3493_s27 = scalar_lea.vmem %s3492_s14, 6144  ;;  %p3494_p10 = scmp.lt.s32.totalorder %s4082_s23, %s3492_s14 }
  0x67   : > { %p3489_p11 = pnand %p3487_p6, %p4089_p7  ;;  %p3495_p8 = scmp.lt.s32.totalorder %s3493_s27, %s3486_s29 }
  0x69   : > { %p3490_p13 = pneg %p3489_p11  ;;  %p3496_p0 = por %p3495_p8, %p3494_p10 }
  0x6b   : > { %p3497_p3 = pnand %p3496_p0, %p3490_p13 }
  0x6d   : > { %3500 = shalt.err (!%p3497_p3)
}
  0x6e   : > { %s3811_s1 = smov 192   ;;  %s3812_s28 = smov 12  }
  0x6f   : > { %3112 = dma.hbm_to_vmem [thread:$0]  (!%p4078_p9), %s4074_s0, 3072, %s4082_s23, %s4028_s10, %s3811_s1, %s3811_s1, %s3812_s28  }
  0x70   : > { %s2910_s4 = sshll.u32 %s3797_s24, 10  ;;  %s4928_s3 = sld [smem:[#allocation43_spill]] }
  0x71   : > { %s4929_s14 = sshll.u32 %s4068_s12, 6  ;;  %s4863_s25 = sshll.u32 %s4068_s12, 8 }
  0x72   : > { %s509_s27 = scalar_lea.vmem [#allocation8], %s4929_s14 }
  0x73   : > { %s516_s2 = sshll.u32 %s509_s27, 4  ;;  %s4121_s2 = int_to_ptr.vmem [resolvable:$true] %s516_s2 }
  0x76   : > { %s4117_s29 = scalar_lea.hbm %s4928_s3, %s2910_s4  ;;  %s3506_s9 = scalar_lea.hbm %s4928_s3, 2048 }
  0x77   : > { %s3501_s6 = scalar_lea.hbm %s4117_s29, 1024  ;;  %p3507_p1 = scmp.lt.u32.totalorder %s4117_s29, %s4928_s3 }
  0x78   : > { %p3502_p8 = scmp.ne.s32.totalorder %s4117_s29, %s3501_s6  ;;  %p3508_p2 = scmp.lt.u32.totalorder %s3506_s9, %s3501_s6 }
  0x79   : > { %p3510_p6 = scmp.lt.u32.totalorder %s3501_s6, %s4117_s29 }
  0x7a   : > { %p3504_p12 = pnand %p3502_p8, %p4089_p7  ;;  %p3509_p5 = por %p3508_p2, %p3507_p1 }
  0x7c   : > { %p3505_p4 = pneg %p3504_p12  ;;  %p3511_p11 = por %p3510_p6, %p3509_p5 }
  0x7e   : > { %p3512_p13 = pnand %p3511_p11, %p3505_p4 }
  0x80   : > { %3515 = shalt.err (!%p3512_p13)
}
  0x81   : > { %s3516_s4 = scalar_lea.vmem %s4121_s2, 1024  ;;  %s3813_s13 = smov [#allocation8]  }
  0x82   : > { %p3517_p10 = scmp.ne.s32.totalorder %s4121_s2, %s3516_s4  ;;  %s3521_s14 = sshll.u32 %s3813_s13, 4  ;;  %s3522_s14 = int_to_ptr.vmem [resolvable:$false] %s3521_s14 }
  0x83   : > { %s3523_s27 = scalar_lea.vmem %s3522_s14, 2048  ;;  %p3524_p8 = scmp.lt.s32.totalorder %s4121_s2, %s3522_s14 }
  0x84   : > { %p3519_p0 = pnand %p3517_p10, %p4089_p7  ;;  %p3525_p12 = scmp.lt.s32.totalorder %s3523_s27, %s3516_s4 }
  0x86   : > { %p3520_p3 = pneg %p3519_p0  ;;  %p3526_p1 = por %p3525_p12, %p3524_p8 }
  0x88   : > { %p3527_p2 = pnand %p3526_p1, %p3520_p3 }
  0x8a   : > { %3530 = shalt.err (!%p3527_p2)
}
  0x8b   : > { %s4861_s6 = smov 64   ;;  %s4862_s0 = smov 4  }
  0x8c   : > { %3115 = dma.hbm_to_vmem [thread:$0]  (!%p4078_p9), %s4117_s29, 1024, %s4121_s2, %s4028_s10, %s4861_s6, %s4861_s6, %s4862_s0  }
  0x8d   : > { %s2911_s23 = sshll.u32 %s3797_s24, 12  ;;  %s4930_s5 = sld [smem:[#allocation45_spill]] }
  0x8e   : > { %s536_s4 = scalar_lea.vmem [#allocation9], %s4863_s25 }
  0x8f   : > { %s543_s13 = sshll.u32 %s536_s4, 4  ;;  %s4159_s13 = int_to_ptr.vmem [resolvable:$true] %s543_s13 }
  0x93   : > { %s4155_s28 = scalar_lea.hbm %s4930_s5, %s2911_s23  ;;  %s3536_s27 = scalar_lea.hbm %s4930_s5, 8192 }
  0x94   : > { %s3531_s14 = scalar_lea.hbm %s4155_s28, 4096  ;;  %p3537_p11 = scmp.lt.u32.totalorder %s4155_s28, %s4930_s5 }
  0x95   : > { %p3532_p4 = scmp.ne.s32.totalorder %s4155_s28, %s3531_s14  ;;  %p3538_p13 = scmp.lt.u32.totalorder %s3536_s27, %s3531_s14 }
  0x96   : > { %p3540_p0 = scmp.lt.u32.totalorder %s3531_s14, %s4155_s28 }
  0x97   : > { %p3534_p5 = pnand %p3532_p4, %p4089_p7  ;;  %p3539_p10 = por %p3538_p13, %p3537_p11 }
  0x99   : > { %p3535_p6 = pneg %p3534_p5  ;;  %p3541_p3 = por %p3540_p0, %p3539_p10 }
  0x9b   : > { %p3542_p8 = pnand %p3541_p3, %p3535_p6 }
  0x9d   : > { %3545 = shalt.err (!%p3542_p8)
}
  0x9e   : > { %s3546_s4 = scalar_lea.vmem %s4159_s13, 4096  ;;  %s3816_s2 = smov [#allocation9]  }
  0x9f   : > { %p3547_p12 = scmp.ne.s32.totalorder %s4159_s13, %s3546_s4  ;;  %s3551_s29 = sshll.u32 %s3816_s2, 4  ;;  %s3552_s29 = int_to_ptr.vmem [resolvable:$false] %s3551_s29 }
  0xa0   : > { %s3553_s9 = scalar_lea.vmem %s3552_s29, 8192  ;;  %p3554_p4 = scmp.lt.s32.totalorder %s4159_s13, %s3552_s29 }
  0xa1   : > { %p3549_p1 = pnand %p3547_p12, %p4089_p7  ;;  %p3555_p5 = scmp.lt.s32.totalorder %s3553_s9, %s3546_s4 }
  0xa3   : > { %p3550_p2 = pneg %p3549_p1  ;;  %p3556_p11 = por %p3555_p5, %p3554_p4 }
  0xa5   : > { %p3557_p13 = pnand %p3556_p11, %p3550_p2 }
  0xa7   : > { %3560 = shalt.err (!%p3557_p13)
}
  0xa8   : > { %s3817_s14 = smov 256   ;;  %s3818_s27 = smov 16  }
  0xa9   : > { %3118 = dma.hbm_to_vmem [thread:$0]  (!%p4078_p9), %s4155_s28, 4096, %s4159_s13, %s4028_s10, %s3817_s14, %s3817_s14, %s3818_s27  }
  0xaa   : > { %s4931_s1 = sld [smem:[#allocation19_spill]]  ;;  %s4184_s4 = sadd.s32 4294967295, %s3805_s26  }
  0xab   : > { %s2750_s2 = sadd.s32 4294967294, %s3805_s26   ;;  %p67_p6 = scmp.ne.s32.totalorder %s3781_s20, %s3777_s19 }
  0xac   : > { %p4858_p10 = scmp.eq.s32.totalorder %s4184_s4, 0  ;;  %p114_p0 = scmp.ne.s32.totalorder %s3769_s17, %s3765_s16 }
  0xad   : > { %p398_p3 = scmp.eq.s32.totalorder %s4184_s4, 3  ;;  %p404_p8 = scmp.eq.s32.totalorder %s2750_s2, 3 }
  0xae   : > { %p4195_p12 = por %p4858_p10, %p67_p6  ;;  %p4201_p1 = por %p114_p0, %p4858_p10 }
  0xaf   : > { %p4934_p2 = scmp.ne.s32.totalorder %s3785_s21, %s3781_s20  ;;  %p4212_p5 = por %p404_p8, %p67_p6 }
  0xb0   : > { %s4932_s29 = scalar_select %p4195_p12, 1, 0 }
  0xb1   : > { %s4933_s28 = scalar_select %p4201_p1, 1, 0 }
  0xb2   : > { %p4208_p4 = por %p398_p3, %p4934_p2  ;;  %s415_s9 = sadd.s32 1, %s3761_s15 }
  0xb3   : > { %s4937_s16 = scalar_select %p4212_p5, 1, 0 }
  0xb4   : > { %s4935_s13 = scalar_select %p4208_p4, 1, 0 }
  0xb5   : > { %4938 = sst [smem:[#allocation36_spill]] %s4937_s16  ;;  %p425_p11 = scmp.ne.s32.totalorder %s3761_s15, %s3757_s30 }
  0xb6   : > { %4936 = sst [smem:[#allocation35_spill]] %s4935_s13  ;;  %p4939_p13 = scmp.ne.s32.totalorder %s4917_s8, 0 }
  0xb7   : > { %p4224_p0 = por %p425_p11, %p398_p3  ;;  %p431_p10 = scmp.ne.s32.totalorder %s3757_s30, %s4931_s1 }
  0xb8   : > { %s4222_s14 = scalar_select %p4939_p13, %s3761_s15, %s415_s9  }
  0xb9   : > { %s4941_s27 = scalar_select %p4224_p0, 1, 0 }
  0xba   : > { %4940 = sst [smem:[#allocation37_spill]] %s4222_s14  ;;  %p2751_p2 = scmp.ge.s32.totalorder %s3805_s26, 1 }
  0xbb   : > { %4942 = sst [smem:[#allocation38_spill]] %s4941_s27  ;;  %p439_p1 = scmp.lt.s32.totalorder %s3805_s26, 5 }
  0xbc   : > { %p4232_p4 = por %p431_p10, %p404_p8  ;;  %s3819_s8 = smov [#allocation5]  }
  0xbd   : > { %p4236_p6 = pnand %p2751_p2, %p439_p1  ;;  %s452_s9 = sshll.u32 %s3819_s8, 4  ;;  %s4242_s9 = int_to_ptr.vmem [resolvable:$true] %s452_s9 }
  0xbe   : > { %s4943_s2 = scalar_select %p4232_p4, 1, 0 }
  0xbf   : > { %s4945_s6 = scalar_select %p4236_p6, 1, 0 }
  0xc0   : > { %4944 = sst [smem:[#allocation39_spill]] %s4943_s2  ;;  %p3102_p3 = pneg %p4236_p6 }
  0xc1   : > { %s4946_s25 = sld [smem:[#allocation47_spill]]  ;;  %s4948_s21 = sshll.u32 %s4068_s12, 8 }
  0xc2   : > { %s564_s22 = scalar_lea.vmem [#allocation10], %s4948_s21  ;;  %p4949_p10 = scmp.eq.s32.totalorder %s4184_s4, 0 }
  0xc3   : > { %s571_s18 = sshll.u32 %s564_s22, 4  ;;  %s4259_s18 = int_to_ptr.vmem [resolvable:$true] %s571_s18 }
  0xc4   : > { %p4255_p8 = pnand %p3102_p3, %p4949_p10 }
  0xc6   : > { %s4950_s8 = scalar_select %p4255_p8, 1, 0 }
  0xc7   : > { %s4947_s3 = smov %s4946_s25  ;;  %s4249_s5 = scalar_lea.hbm %s4946_s25, %s2911_s23 }
  0xc8   : > { %s3561_s24 = scalar_lea.hbm %s4249_s5, 4096  ;;  %s3566_s0 = scalar_lea.hbm %s4947_s3, 8192 }
  0xc9   : > { %p3562_p1 = scmp.ne.s32.totalorder %s4249_s5, %s3561_s24  ;;  %p3567_p2 = scmp.lt.u32.totalorder %s4249_s5, %s4947_s3 }
  0xca   : > { %p3568_p4 = scmp.lt.u32.totalorder %s3566_s0, %s3561_s24  ;;  %p3570_p10 = scmp.lt.u32.totalorder %s3561_s24, %s4249_s5 }
  0xcb   : > { %p3564_p11 = pnand %p3562_p1, %p4089_p7 }
  0xcc   : > { %p3569_p3 = por %p3568_p4, %p3567_p2 }
  0xcd   : > { %p3565_p13 = pneg %p3564_p11 }
  0xce   : > { %p3571_p5 = por %p3570_p10, %p3569_p3 }
  0xd0   : > { %p3572_p0 = pnand %p3571_p5, %p3565_p13 }
  0xd2   : > { %3575 = shalt.err (!%p3572_p0)
}
  0xd3   : > { %s3576_s21 = scalar_lea.vmem %s4259_s18, 4096  ;;  %s3820_s22 = smov [#allocation10]  }
  0xd4   : > { %p3577_p1 = scmp.ne.s32.totalorder %s4259_s18, %s3576_s21  ;;  %s3581_s25 = sshll.u32 %s3820_s22, 4  ;;  %s3582_s25 = int_to_ptr.vmem [resolvable:$false] %s3581_s25 }
  0xd5   : > { %s3583_s12 = scalar_lea.vmem %s3582_s25, 8192  ;;  %p3584_p6 = scmp.lt.s32.totalorder %s4259_s18, %s3582_s25 }
  0xd6   : > { %p3579_p11 = pnand %p3577_p1, %p4089_p7  ;;  %p3585_p8 = scmp.lt.s32.totalorder %s3583_s12, %s3576_s21 }
  0xd8   : > { %p3580_p12 = pneg %p3579_p11  ;;  %p3586_p4 = por %p3585_p8, %p3584_p6 }
  0xda   : > { %p3587_p2 = pnand %p3586_p4, %p3580_p12 }
  0xdc   : > { %3590 = shalt.err (!%p3587_p2)
}
  0xdd   : > { %s4951_s24 = smov 4   ;;  %s4952_s0 = smov 64  }
  0xde   : > { %3121 = dma.hbm_to_vmem [thread:$0]  (!%p4078_p9), %s4249_s5, 4096, %s4259_s18, %s4028_s10, %s4952_s0, %s4952_s0, %s4951_s24  }
  0xdf   : > { %s4953_s1 = sld [smem:[#allocation41_spill]]  ;;  %p4954_p12 = scmp.ne.s32.totalorder %s4950_s8, 0 }
  0xe1   : > { %p3593_p5 = pneg %p4954_p12 }
  0xe5   : > { %s3591_s22 = scalar_lea.hbm %s4953_s1, 128 }
  0xe6   : > { %p3592_p7 = scmp.ne.s32.totalorder %s4953_s1, %s3591_s22  ;;  %p3598_p8 = scmp.lt.u32.totalorder %s3591_s22, %s4953_s1 }
  0xe8   : > { %p3594_p0 = pnand %p3593_p5, %p3592_p7 }
  0xea   : > { %p3595_p6 = pneg %p3594_p0 }
  0xec   : > { %p3600_p13 = pnand %p3598_p8, %p3595_p6 }
  0xee   : > { %3603 = shalt.err (!%p3600_p13)
}
  0xef   : > { %s3604_s5 = scalar_lea.vmem %s4242_s9, 128  ;;  %p3612_p1 = scmp.lt.s32.totalorder %s4242_s9, %s4242_s9 }
  0xf0   : > { %p3605_p9 = scmp.ne.s32.totalorder %s4242_s9, %s3604_s5  ;;  %p3613_p11 = scmp.lt.s32.totalorder %s3604_s5, %s3604_s5 }
  0xf2   : > { %p3607_p3 = pnand %p3605_p9, %p3593_p5  ;;  %p3614_p4 = por %p3613_p11, %p3612_p1 }
  0xf4   : > { %p3608_p10 = pneg %p3607_p3 }
  0xf6   : > { %p3615_p2 = pnand %p3614_p4, %p3608_p10 }
  0xf8   : > { %3618 = shalt.err (!%p3615_p2)
}
  0xf9   : > { %3105 = dma.hbm_to_vmem [thread:$0]  (!%p4954_p12), %s4953_s1, 128, %s4242_s9, [#allocation6]  }
  0xfa   : > { %p4955_p7 = scmp.ne.s32.totalorder %s4945_s6, 0 }
  0xfb   : > { %s615_s10 = sand.u32 (!%p4955_p7), 1, %s4184_s4   ;;  %s4873_s12 = sand.u32 (!%p4955_p7), 1, %s3781_s20  }
  0xfc   : > { %613 = sbr.rel (%p4955_p7) target bundleno = 3328 (0xd00), region = 72  ;;  %s2768_s24 = sshll.u32 (!%p4955_p7), %s4873_s12, 4 }
  0xfd   : > { %s616_s0 = scalar_lea.sflag (!%p4955_p7), [#allocation3], %s615_s10  ;;  %s4313_s11 = scalar_lea.vmem (!%p4955_p7), [#allocation2], %s2768_s24 }
  0xfe   : > { %p4956_p5 = scmp.ne.s32.totalorder (!%p4955_p7), %s4932_s29, 0 }
 0x103   : > { %3732 = dma.done.wait (%p4956_p5), %s616_s0, 256  }
 0x104   : > { %3734 = vsyncadd (%p4956_p5), %s616_s0, 4294967040  ;;  %p4957_p12 = scmp.eq.s32.totalorder %s4184_s4, 0 }
 0x106   : > { %3736 = dma.done.wait (%p4957_p12), [#allocation6], 128   ;;  %p4958_p0 = pmov %p4957_p12 }
 0x107   : > { %s630_s6 = sand.u32 1, %s3769_s17   ;;  %p4959_p6 = scmp.ne.s32.totalorder %s4933_s28, 0 }
 0x108   : > { %3738 = vsyncadd (%p4958_p0), [#allocation6], 4294967168  ;;  %s3083_s9 = smul.u32 192, %s630_s6 }
 0x10a   : > { %s4324_s8 = scalar_lea.vmem [#allocation7], %s3083_s9 }
 0x10b   : > { %3740 = dma.done.wait (%p4959_p6), %s616_s0, 12288  }
 0x10c   : > { %3742 = vsyncadd (%p4959_p6), %s616_s0, 4294955008  ;;  %s4960_s29 = sld [smem:[#allocation26_spill]]  ;;  %s2770_s23 = sshll.u32 %s630_s6, 6 }
 0x10d   : > { %s2771_s22 = sshll.u32 %s630_s6, 8  ;;  %s4872_s25 = sand.u32 1, %s3757_s30  }
 0x10e   : > { %s2774_s4 = sshll.u32 %s4872_s25, 5  ;;  %s4962_s6 = sld [smem:[#allocation46_spill]] }
 0x10f   : > { %s4963_s1 = sld [smem:[#allocation48_spill]]  ;;  %s4964_s21 = sld [smem:[#allocation49_spill]] }
 0x110   : > { %s4965_s19 = sld [smem:[#allocation50_spill]]  ;;  %s4966_s28 = sld [smem:[#allocation51_spill]] }
 0x111   : > { %s4369_s12 = scalar_lea.vmem [#allocation9], %s2771_s22  ;;  %s4373_s15 = scalar_lea.vmem [#allocation11], %s2768_s24 }
 0x112   : > { %p752_p8 = scmp.lt.s32.totalorder %s4960_s29, 1  ;;  %s4375_s14 = scalar_lea.vmem [#allocation12], %s2774_s4 }
 0x113   : > { %p2776_p13 = scmp.ne.s32.totalorder %s4960_s29, 0 }
 0x114   : > { %s4335_s7 = scalar_select %p752_p8, %s4960_s29, 1 }
 0x115   : > { %v781_v0 = vld [vmem:[%s4313_s11] sm:$0xff] (!%p2776_p13)  ;;  %v782_v2 = vld [vmem:[%s4313_s11 + $0x8] sm:$0xff] (!%p2776_p13) }
 0x116   : > { %s2775_s18 = sshll.u32 %s4335_s7, 2  ;;  %s761_s17 = scalar_lea.vmem %s4963_s1, %s4335_s7  ;;  %v783_v1 = vld [vmem:[#allocation5] sm:$0xff] (!%p2776_p13) }
 0x117   : > { %s4345_s9 = scalar_lea.vmem %s4962_s6, %s2775_s18  ;;  %s764_s5 = scalar_lea.vmem %s4964_s21, %s4335_s7  ;;  %v784_v3 = vadd.f32 (!%p2776_p13), %v783_v1, %v781_v0  ;;  %v785_v4 = vadd.f32 (!%p2776_p13), %v783_v1, %v782_v2 }
 0x118   : > { %s767_s26 = scalar_lea.vmem %s4965_s19, %s4335_s7  ;;  %s770_s30 = scalar_lea.vmem %s4966_s28, %s4335_s7 }
 0x119   : > { %s4967_s18 = sld [smem:[#allocation52_spill]]  ;;  %s4367_s6 = scalar_lea.vmem [#allocation8], %s2770_s23  ;;  %786 = vst [vmem:[%s4373_s15] sm:$0xff] (!%p2776_p13), %v784_v3  ;;  %787 = vst [vmem:[%s4373_s15 + $0x8] sm:$0xff] (!%p2776_p13), %v785_v4 }
 0x11a   : > { %s4371_s1 = scalar_lea.vmem [#allocation10], %s2771_s22  ;;  %780 = sbr.rel (%p2776_p13) target bundleno = 289 (0x121), region = 100 }
 0x11f   : > { %s773_s0 = scalar_lea.vmem %s4967_s18, %s4335_s7 }
 0x121 PF: > { %v4383_v5 = vld [vmem:[%s4373_s15] sm:$0xff]  ;;  %v4386_v6 = vld [vmem:[%s4373_s15 + $0x8] sm:$0xff]  ;;  %v3821_v9 = vmov 0.0   ;;  %v3822_v35 = vmov 0   ;;  %vm3823_vm0 = vmmov 0   ;;  %vm1087_vm1 = vcmask 523264  }
 0x122   : > { %792 = vadd.xlane.f32.xlu0 %v4383_v5  ;;  %v3265_v7 = vld [vmem:[%s4324_s8 + $0x4] ss:$12 sps:$4 sm:$0xff]   ;;  %v3267_v8 = vld [vmem:[%s4324_s8] ss:$12 sps:$4 sm:$0xff]   ;;  %2993 = vmatprep.subr.bf16.mxu1 %v3821_v9  ;;  %v3268_v10 = vld [vmem:[%s4324_s8 + $0x8] ss:$12 sps:$4 sm:$0xff]  }
 0x123   : > { %v3269_v11 = vld [vmem:[%s4324_s8 + $0x1c] ss:$12 sps:$4 sm:$0xff]   ;;  %992 = vmatprep.subr.bf16.mxu0 %v3265_v7  ;;  %2994 = vmatpush3.bf16.msra.mxu1 %v3268_v10  ;;  %v3271_v20 = vld [vmem:[%s4324_s8 + $0x18] ss:$12 sps:$4 sm:$0xff]   ;;  %v3272_v21 = vld [vmem:[%s4324_s8 + $0x20] ss:$12 sps:$4 sm:$0xff]  }
 0x124   : > { %993 = vmatpush1.bf16.msra.mxu0 %v3267_v8  ;;  %2995 = vmatprep.subr.bf16.mxu1 %v3821_v9  ;;  %v3273_v22 = vld [vmem:[%s4324_s8 + $0x34] ss:$12 sps:$4 sm:$0xff]   ;;  %v3275_v23 = vld [vmem:[%s4324_s8 + $0x30] ss:$12 sps:$4 sm:$0xff]   ;;  %v3276_v24 = vld [vmem:[%s4324_s8 + $0x38] ss:$12 sps:$4 sm:$0xff]  }
 0x125   : > { %994 = vmatprep.subr.bf16.mxu0 %v3269_v11  ;;  %v3277_v25 = vld [vmem:[%s4324_s8 + $0x4c] ss:$12 sps:$4 sm:$0xff]   ;;  %v3279_v26 = vld [vmem:[%s4324_s8 + $0x48] ss:$12 sps:$4 sm:$0xff]   ;;  %v3280_v27 = vld [vmem:[%s4324_s8 + $0x50] ss:$12 sps:$4 sm:$0xff]   ;;  %1024 = vmatprep.mubr.bf16.mxu0 %v3822_v35 }
 0x126   : > { %794 = vadd.xlane.f32.xlu0 %v4386_v6  ;;  %v3281_v28 = vld [vmem:[%s4324_s8 + $0x64] ss:$12 sps:$4 sm:$0xff]   ;;  %v3283_v29 = vld [vmem:[%s4324_s8 + $0x60] ss:$12 sps:$4 sm:$0xff]   ;;  %v3284_v30 = vld [vmem:[%s4324_s8 + $0x68] ss:$12 sps:$4 sm:$0xff]   ;;  %3009 = vmatprep.mubr.msk.bf16.mxu1 %vm3823_vm0, %v3821_v9 }
 0x127   : > { %2996 = vmatpush3.bf16.msra.mxu1 %v3272_v21  ;;  %v3285_v31 = vld [vmem:[%s4324_s8 + $0x7c] ss:$12 sps:$4 sm:$0xff]   ;;  %v3287_v32 = vld [vmem:[%s4324_s8 + $0x78] ss:$12 sps:$4 sm:$0xff]   ;;  %v3288_v33 = vld [vmem:[%s4324_s8 + $0x80] ss:$12 sps:$4 sm:$0xff]  }
 0x128   : > { %995 = vmatpush1.bf16.msra.mxu0 %v3271_v20  ;;  %2997 = vmatprep.subr.bf16.mxu1 %v3821_v9  ;;  %v3289_v34 = vld [vmem:[%s4324_s8 + $0x94] ss:$12 sps:$4 sm:$0xff]   ;;  %v3291_v36 = vld [vmem:[%s4324_s8 + $0x90] ss:$12 sps:$4 sm:$0xff]   ;;  %v3292_v37 = vld [vmem:[%s4324_s8 + $0x98] ss:$12 sps:$4 sm:$0xff]  }
 0x129   : > { %996 = vmatprep.subr.bf16.mxu0 %v3273_v22  ;;  %v3293_v38 = vld [vmem:[%s4324_s8 + $0xac] ss:$12 sps:$4 sm:$0xff]   ;;  %v3295_v39 = vld [vmem:[%s4324_s8 + $0xa8] ss:$12 sps:$4 sm:$0xff]   ;;  %v3296_v40 = vld [vmem:[%s4324_s8 + $0xb0] ss:$12 sps:$4 sm:$0xff]  }
 0x12a   : > { %v2777_v49 = vld [vmem:[%s764_s5] ss:$0 sm:$0xff]  ;;  %vm1216_vm2 = vcmask 1043456   ;;  %vm1186_vm4 = vcmask 64512   ;;  %s4970_s23 = sld [smem:[#allocation44_spill]] }
 0x12b   : > { %2998 = vmatpush3.bf16.msra.mxu1 %v3276_v24  ;;  %v2778_v53 = vld [vmem:[%s767_s26] ss:$0 sm:$0xff]  ;;  %s3824_s26 = smov 64  }
 0x12c   : > { %997 = vmatpush1.bf16.msra.mxu0 %v3275_v23  ;;  %2999 = vmatprep.subr.bf16.mxu1 %v3821_v9 }
 0x12d   : > { %998 = vmatprep.subr.bf16.mxu0 %v3277_v25 }
 0x12f   : > { %3000 = vmatpush3.bf16.msra.mxu1 %v3280_v27 }
 0x130   : > { %999 = vmatpush1.bf16.msra.mxu0 %v3279_v26  ;;  %3001 = vmatprep.subr.bf16.mxu1 %v3821_v9  ;;  %s4971_s22 = scalar_lea.vmem %s4970_s23, %s4335_s7  ;;  %s4975_s7 = sld [smem:[#allocation26_spill]] }
 0x131   : > { %1000 = vmatprep.subr.bf16.mxu0 %v3281_v28 }
 0x133   : > { %3002 = vmatpush3.bf16.msra.mxu1 %v3284_v30 }
 0x134   : > { %1001 = vmatpush1.bf16.msra.mxu0 %v3283_v29  ;;  %3003 = vmatprep.subr.bf16.mxu1 %v3821_v9 }
 0x135   : > { %1002 = vmatprep.subr.bf16.mxu0 %v3285_v31 }
 0x136   : > { %p2897_p9 = scmp.ne.s32.totalorder %s4975_s7, 1 }
 0x137   : > { %3004 = vmatpush3.bf16.msra.mxu1 %v3288_v33 }
 0x138   : > { %1003 = vmatpush1.bf16.msra.mxu0 %v3287_v32  ;;  %3005 = vmatprep.subr.bf16.mxu1 %v3821_v9 }
 0x139   : > { %1004 = vmatprep.subr.bf16.mxu0 %v3289_v34 }
 0x13b   : > { %3006 = vmatpush3.bf16.msra.mxu1 %v3292_v37 }
 0x13c   : > { %1005 = vmatpush1.bf16.msra.mxu0 %v3291_v36  ;;  %3007 = vmatprep.subr.bf16.mxu1 %v3821_v9 }
 0x13d   : > { %1006 = vmatprep.subr.bf16.mxu0 %v3293_v38 }
 0x13f   : > { %3008 = vmatpush3.bf16.msra.mxu1 %v3296_v40 }
 0x140   : > { %1007 = vmatpush1.bf16.msra.mxu0 %v3295_v39  ;;  %3013 = vmatprep.subr.bf16.mxu1 %v3821_v9 }
 0x141   : > { %3037 = vmatprep.subr.bf16.mxu0 %v3821_v9 }
 0x1af   : > { %v793_v12 = vpop.xlane.xlu0 %792 }
 0x1b0   : > { %v797_v13 = vmul.f32 0.0078125, %v793_v12 }
 0x1b2   : > { %v4397_v14 = vsub.f32 %v4383_v5, %v797_v13  ;;  %v1082_v13 = vlaneseq }
 0x1b3   : > { %v795_v15 = vpop.xlane.xlu0 %794 }
 0x1b4   : > { %v798_v16 = vmul.f32 0.0078125, %v795_v15  ;;  %v801_v17 = vmul.f32 %v4397_v14, %v4397_v14  ;;  %v4472_v15 = vand.u32 127, %v1082_v13 }
 0x1b6   : > { %v4402_v18 = vsub.f32 %v4386_v6, %v798_v16  ;;  %803 = vadd.xlane.f32.xlu1 %v801_v17 }
 0x1b8   : > { %v802_v19 = vmul.f32 %v4402_v18, %v4402_v18 }
 0x1ba   : > { %805 = vadd.xlane.f32.xlu1 %v802_v19 }
 0x243   : > { %v804_v41 = vpop.xlane.xlu1 %803 }
 0x244   : > { %v807_v42 = vmul.f32 0.0078125, %v804_v41 }
 0x246   : > { %v809_v43 = vadd.f32 1e-05, %v807_v42 }
 0x247   : > { %v806_v44 = vpop.xlane.xlu1 %805 }
 0x248   : > { %3385 = vrsqrt.f32 %v809_v43  ;;  %v808_v45 = vmul.f32 0.0078125, %v806_v44 }
 0x24a   : > { %v810_v46 = vadd.f32 1e-05, %v808_v45 }
 0x24c   : > { %3387 = vrsqrt.f32 %v810_v46 }
 0x252   : > { %v3386_v47 = vpop.eup %3385 }
 0x253   : > { %v813_v48 = vmul.f32 %v3386_v47, %v4397_v14  ;;  %v4470_v14 = vshrl.u32 %v1082_v13, 7 }
 0x255   : > { %v821_v52 = vmul.f32 %v2777_v49, %v813_v48  ;;  %vm1086_vm3 = vcmp.le.s32.totalorder %v4472_v15, %v4470_v14 }
 0x256   : > { %v3388_v50 = vpop.eup %3387 }
 0x257   : > { %v814_v51 = vmul.f32 %v3388_v50, %v4402_v18  ;;  %v829_v55 = vadd.f32 %v2778_v53, %v821_v52 }
 0x259   : > { %v822_v54 = vmul.f32 %v2777_v49, %v814_v51 }
 0x25b   : > { %v830_v56 = vadd.f32 %v2778_v53, %v822_v54 }
 0x25d   : > { %v831_v57 = vpack.c.bf16 %v830_v56, %v829_v55 }
 0x25f   : > { %1025 = vmatmul.mubr.bf16.vlgmr.msra.gmra.mrb[0].mxu0 %v831_v57  ;;  %3010 = vmatmul.mubr.bf16.vlgmr.msra.gmra.mrb[0].mxu1 %v831_v57 }
 0x260   : > { %3015 = vmatprep.mubr.msk.bf16.mxu1 %vm3823_vm0, %v3821_v9  ;;  %3039 = vmatprep.mubr.msk.bf16.mxu0 %vm3823_vm0, %v3821_v9 }
 0x332   : > { %v1026_v58 = vpop.f32.mrb[0].mxu0  ;;  %v1069_v59 = vpop.f32.mrb[0].mxu1 }
 0x333   : > { %v1028_v60 = vpop.f32.mrb[1].mxu0  ;;  %v3011_v61 = vpop.f32.mrb[1].mxu1  ;;  %v1076_v7 = vpack.c.bf16 %v1026_v58, %v1026_v58  ;;  %v4462_v10 = vpack.c.bf16 %v1069_v59, %v1069_v59 }
 0x334   : > { %v1078_v62 = vpack.c.bf16 %v1028_v60, %v1028_v60  ;;  %v1030_v63 = vpop.f32.mrb[2].mxu0  ;;  %v4453_v0 = vpop.f32.mrb[2].mxu1 }
 0x335   : > { %v1032_v1 = vpop.f32.mrb[3].mxu0  ;;  %v3012_v2 = vpop.f32.mrb[3].mxu1  ;;  %v1077_v11 = vpack.c.bf16 %v1030_v63, %v1030_v63  ;;  %v1218_v12 = vsel %vm1216_vm2, %v4462_v10, 0  ;;  %v1081_v47 = vpack.c.bf16 %v4453_v0, %v4453_v0 }
 0x336   : > { %v1092_v3 = vsel %vm1087_vm1, %v1078_v62, 0  ;;  %v1079_v4 = vpack.c.bf16 %v1032_v1, %v1032_v1 }
 0x337   : > { %3014 = vmatpush3.bf16.xpose.msra.mxu1 %v1092_v3  ;;  %v1264_v51 = vsel %vm1216_vm2, %v1081_v47, 0 }
 0x338   : > { %3019 = vmatprep.subr.bf16.mxu1 %v3821_v9  ;;  %v1138_v8 = vsel %vm1087_vm1, %v1079_v4, 0 }
 0x33e   : > { %3016 = vmatmul.mubr.msk.bf16.vlgmr.msra.gmra.mrb[4].mxu1 %vm1087_vm1, %v1076_v7 }
 0x33f   : > { %3020 = vmatpush3.bf16.xpose.msra.mxu1 %v1138_v8  ;;  %3021 = vmatprep.mubr.msk.bf16.mxu1 %vm3823_vm0, %v3821_v9 }
 0x340   : > { %3025 = vmatprep.subr.bf16.mxu1 %v3821_v9 }
 0x346   : > { %3022 = vmatmul.mubr.msk.bf16.vlgmr.msra.gmra.mrb[8].mxu1 %vm1087_vm1, %v1077_v11 }
 0x347   : > { %3026 = vmatpush3.bf16.msra.mxu1 %v1218_v12  ;;  %3027 = vmatprep.mubr.msk.bf16.mxu1 %vm3823_vm0, %v3821_v9 }
 0x348   : > { %3031 = vmatprep.subr.bf16.mxu1 %v3821_v9 }
 0x411   : > { %v1128_v16 = vpop.f32.mrb[4].mxu1 }
 0x412   : > { %v1180_v17 = vmul.f32 0.125, %v1128_v16  ;;  %v3017_v18 = vpop.f32.mrb[5].mxu1 }
 0x413   : > { %v1131_v19 = vpop.f32.mrb[6].mxu1 }
 0x414   : > { %v3018_v20 = vpop.f32.mrb[7].mxu1  ;;  %v1184_v21 = vsel %vm1086_vm3, %v1180_v17, -1e+30 }
 0x415   : > { %v1187_v22 = vsel %vm1186_vm4, %v1184_v21, -inf }
 0x416   : > { %1188 = vmax.xlane.f32.xlu0 %v1187_v22 }
 0x419   : > { %v1174_v23 = vpop.f32.mrb[8].mxu1 }
 0x41a   : > { %v1181_v24 = vmul.f32 0.125, %v1174_v23  ;;  %v3023_v25 = vpop.f32.mrb[9].mxu1 }
 0x41b   : > { %v1177_v26 = vpop.f32.mrb[10].mxu1 }
 0x41c   : > { %v3024_v27 = vpop.f32.mrb[11].mxu1  ;;  %v1185_v28 = vsel %vm1086_vm3, %v1181_v24, -1e+30 }
 0x41d   : > { %v1190_v29 = vsel %vm1186_vm4, %v1185_v28, -inf }
 0x41e   : > { %1191 = vmax.xlane.f32.xlu1 %v1190_v29 }
 0x42f   : > { %1362 = vrot.lane.b32.xlu1 %v1079_v4, %s3824_s26 }
 0x4a3   : > { %v1189_v30 = vpop.xlane.xlu0 %1188 }
 0x4a4   : > { %v1193_v31 = vsub.f32 %v1184_v21, %v1189_v30 }
 0x4a6   : > { %v1195_v32 = vmul.f32 1.442695, %v1193_v31 }
 0x4a8   : > { %3389 = vpow2.f32 %v1195_v32 }
 0x4ab   : > { %v1192_v33 = vpop.xlane.xlu1 %1191 }
 0x4ac   : > { %v1194_v34 = vsub.f32 %v1185_v28, %v1192_v33 }
 0x4ae   : > { %v1197_v36 = vmul.f32 1.442695, %v1194_v34 }
 0x4af   : > { %v1363_v42 = vpop.permute.xlu1 %1362 }
 0x4b0   : > { %3391 = vpow2.f32 %v1197_v36  ;;  %v1368_v55 = vsel %vm1087_vm1, %v1363_v42, 0  ;;  %v3297_v42 = vld [vmem:[%s4367_s6] sm:$0xff]  }
 0x4b2   : > { %v3390_v37 = vpop.eup %3389 }
 0x4b3   : > { %v1199_v38 = vsel %vm1186_vm4, %v3390_v37, 0.0 }
 0x4b4   : > { %1200 = vadd.xlane.f32.xlu0 %v1199_v38 }
 0x4ba   : > { %v3392_v39 = vpop.eup %3391 }
 0x4bb   : > { %v1202_v40 = vsel %vm1186_vm4, %v3392_v39, 0.0 }
 0x4bc   : > { %1203 = vadd.xlane.f32.xlu1 %v1202_v40 }
 0x4ca   : > { %1310 = vrot.lane.b32.xlu0 %v1078_v62, %s3824_s26 }
 0x4cd   : > { %1307 = vrot.lane.b32.xlu1 %v1076_v7, %s3824_s26 }
 0x4d1   : > { %1359 = vrot.lane.b32.xlu1 %v1077_v11, %s3824_s26 }
 0x541   : > { %v1201_v41 = vpop.xlane.xlu0 %1200 }
 0x542   : > { %3393 = vrcp.f32 %v1201_v41 }
 0x545   : > { %v1311_v43 = vpop.permute.xlu0 %1310 }
 0x546   : > { %v1316_v44 = vsel %vm1087_vm1, %v1311_v43, 0  ;;  %v3298_v43 = vld [vmem:[%s4367_s6 + $0x8] sm:$0xff]  }
 0x547   : > { %3038 = vmatpush3.bf16.xpose.msra.mxu0 %v1316_v44  ;;  %v3299_v44 = vld [vmem:[%s4367_s6 + $0x10] sm:$0xff]  }
 0x548   : > { %3049 = vmatprep.subr.bf16.mxu0 %v3821_v9 }
 0x549   : > { %v1204_v45 = vpop.xlane.xlu1 %1203 }
 0x54a   : > { %3395 = vrcp.f32 %v1204_v45  ;;  %v3300_v45 = vld [vmem:[%s4367_s6 + $0x18] sm:$0xff]  }
 0x54c   : > { %v3394_v46 = vpop.eup %3393 }
 0x54d   : > { %v1207_v48 = vmul.f32 %v3394_v46, %v3390_v37  ;;  %v1308_v49 = vpop.permute.xlu1 %1307  ;;  %v3301_v46 = vld [vmem:[%s4367_s6 + $0x20] sm:$0xff]  }
 0x54e   : > { %3040 = vmatmul.mubr.msk.bf16.vlgmr.msra.gmra.mrb[4].mxu0 %vm1087_vm1, %v1308_v49  ;;  %v3304_v49 = vld [vmem:[%s4367_s6 + $0x38] sm:$0xff]  }
 0x54f   : > { %1209 = vst.msk [vmem:[%s4375_s14] sm:$0xff] %vm1186_vm4, %v1207_v48  ;;  %v1211_v50 = vpack.c.bf16 %v1207_v48, %v1207_v48  ;;  %3051 = vmatprep.mubr.msk.bf16.mxu0 %vm3823_vm0, %v3821_v9  ;;  %v3303_v48 = vld [vmem:[%s4367_s6 + $0x30] sm:$0xff]  }
 0x551   : > { %3028 = vmatmul.mubr.msk.bf16.vlgmr.msra.gmra.mrb[12].mxu1 %vm1186_vm4, %v1211_v50  ;;  %v1360_v56 = vpop.permute.xlu1 %1359 }
 0x552   : > { %3032 = vmatpush3.bf16.msra.mxu1 %v1264_v51  ;;  %3033 = vmatprep.mubr.msk.bf16.mxu1 %vm3823_vm0, %v3821_v9 }
 0x553   : > { %3043 = vmatprep.subr.bf16.mxu1 %v3821_v9 }
 0x554   : > { %v3396_v52 = vpop.eup %3395 }
 0x555   : > { %v1208_v53 = vmul.f32 %v3396_v52, %v3392_v39 }
 0x557   : > { %1210 = vst.msk [vmem:[%s4375_s14 + $0x10] sm:$0xff] %vm1186_vm4, %v1208_v53  ;;  %v1212_v54 = vpack.c.bf16 %v1208_v53, %v1208_v53 }
 0x559   : > { %3034 = vmatmul.mubr.msk.bf16.vlgmr.msra.gmra.mrb[16].mxu1 %vm1186_vm4, %v1212_v54 }
 0x55a   : > { %3045 = vmatprep.mubr.msk.bf16.mxu1 %vm3823_vm0, %v3821_v9 }
 0x55b   : > { %3044 = vmatpush3.bf16.xpose.msra.mxu1 %v1368_v55 }
 0x55c   : > { %3055 = vmatprep.subr.bf16.mxu1 %v3821_v9 }
 0x562   : > { %3046 = vmatmul.mubr.msk.bf16.vlgmr.msra.gmra.mrb[20].mxu1 %vm1087_vm1, %v1360_v56 }
 0x563   : > { %3057 = vmatprep.mubr.msk.bf16.mxu1 %vm3823_vm0, %v3821_v9 }
 0x621   : > { %v1352_v57 = vpop.f32.mrb[4].mxu0 }
 0x622   : > { %v1410_v58 = vmul.f32 0.125, %v1352_v57  ;;  %v3041_v59 = vpop.f32.mrb[5].mxu0 }
 0x623   : > { %v1355_v60 = vpop.f32.mrb[6].mxu0 }
 0x624   : > { %v4514_v61 = vpop.f32.mrb[12].mxu1  ;;  %v3042_v62 = vpop.f32.mrb[7].mxu0  ;;  %v1412_v63 = vsel %vm1086_vm3, %v1410_v58, -1e+30 }
 0x625   : > { %v3029_v0 = vpop.f32.mrb[13].mxu1  ;;  %v1414_v1 = vsel %vm1186_vm4, %v1412_v63, -inf }
 0x626   : > { %1415 = vmax.xlane.f32.xlu0 %v1414_v1  ;;  %v1257_v2 = vpop.f32.mrb[14].mxu1  ;;  %v2813_v1 = vld [vmem:[%s4971_s22] ss:$0 sm:$0xff] }
 0x627   : > { %v3030_v3 = vpop.f32.mrb[15].mxu1 }
 0x62c   : > { %v4520_v4 = vpop.f32.mrb[16].mxu1 }
 0x62d   : > { %v3035_v7 = vpop.f32.mrb[17].mxu1 }
 0x62e   : > { %v1303_v8 = vpop.f32.mrb[18].mxu1 }
 0x62f   : > { %v3036_v11 = vpop.f32.mrb[19].mxu1 }
 0x635   : > { %v1404_v12 = vpop.f32.mrb[20].mxu1 }
 0x636   : > { %v1411_v13 = vmul.f32 0.125, %v1404_v12  ;;  %v3047_v16 = vpop.f32.mrb[21].mxu1  ;;  %v3305_v12 = vld [vmem:[%s4369_s12] ss:$16 sps:$4 sm:$0xff]  }
 0x637   : > { %v1407_v17 = vpop.f32.mrb[22].mxu1  ;;  %v3308_v16 = vld [vmem:[%s4369_s12 + $0x8] ss:$16 sps:$4 sm:$0xff]  }
 0x638   : > { %v3048_v18 = vpop.f32.mrb[23].mxu1  ;;  %v1413_v19 = vsel %vm1086_vm3, %v1411_v13, -1e+30  ;;  %v3307_v13 = vld [vmem:[%s4369_s12 + $0x4] ss:$16 sps:$4 sm:$0xff]  }
 0x639   : > { %v1417_v20 = vsel %vm1186_vm4, %v1413_v19, -inf  ;;  %v3310_v17 = vld [vmem:[%s4369_s12 + $0xc] ss:$16 sps:$4 sm:$0xff]   ;;  %v3313_v18 = vld [vmem:[%s4369_s12 + $0x24] ss:$16 sps:$4 sm:$0xff]  }
 0x63a   : > { %1418 = vmax.xlane.f32.xlu1 %v1417_v20 }
 0x64b   : > { %1491 = vrot.lane.b32.xlu1 %v1081_v47, %s3824_s26  ;;  %v3302_v47 = vld [vmem:[%s4367_s6 + $0x28] sm:$0xff]  }
 0x6b3   : > { %v1416_v21 = vpop.xlane.xlu0 %1415 }
 0x6b4   : > { %v1420_v22 = vsub.f32 %v1412_v63, %v1416_v21 }
 0x6b6   : > { %v1422_v23 = vmul.f32 1.442695, %v1420_v22 }
 0x6b8   : > { %3397 = vpow2.f32 %v1422_v23 }
 0x6c2   : > { %v3398_v24 = vpop.eup %3397 }
 0x6c3   : > { %v1426_v25 = vsel %vm1186_vm4, %v3398_v24, 0.0 }
 0x6c4   : > { %1427 = vadd.xlane.f32.xlu0 %v1426_v25 }
 0x6c7   : > { %v1419_v26 = vpop.xlane.xlu1 %1418 }
 0x6c8   : > { %v1421_v27 = vsub.f32 %v1413_v19, %v1419_v26  ;;  %v3316_v19 = vld [vmem:[%s4369_s12 + $0x2c] ss:$16 sps:$4 sm:$0xff]  }
 0x6ca   : > { %v1424_v28 = vmul.f32 1.442695, %v1421_v27 }
 0x6cb   : > { %v1492_v29 = vpop.permute.xlu1 %1491 }
 0x6cc   : > { %3399 = vpow2.f32 %v1424_v28  ;;  %v1497_v15 = vsel %vm1216_vm2, %v1492_v29, 0  ;;  %v3319_v28 = vld [vmem:[%s4369_s12 + $0x44] ss:$16 sps:$4 sm:$0xff]   ;;  %v3322_v29 = vld [vmem:[%s4369_s12 + $0x4c] ss:$16 sps:$4 sm:$0xff]  }
 0x6cd   : > { %3056 = vmatpush3.bf16.msra.mxu1 %v1497_v15  ;;  %v3317_v15 = vld [vmem:[%s4369_s12 + $0x40] ss:$16 sps:$4 sm:$0xff]  }
 0x6ce   : > { %1919 = vmatprep.subr.bf16.mxu1 %v3307_v13  ;;  %v3358_v13 = vld [vmem:[%s4371_s1 + $0xc8] sm:$0xff]  }
 0x6d6   : > { %v3400_v30 = vpop.eup %3399 }
 0x6d7   : > { %v1429_v31 = vsel %vm1186_vm4, %v3400_v30, 0.0 }
 0x6d8   : > { %1430 = vadd.xlane.f32.xlu0 %v1429_v31  ;;  %v3325_v31 = vld [vmem:[%s4369_s12 + $0x64] ss:$16 sps:$4 sm:$0xff]  }
 0x6ee   : > { %1442 = vrot.lane.b32.xlu0 %v4462_v10, %s3824_s26 }
 0x751   : > { %v1428_v32 = vpop.xlane.xlu0 %1427 }
 0x752   : > { %3401 = vrcp.f32 %v1428_v32  ;;  %v3328_v32 = vld [vmem:[%s4369_s12 + $0x6c] ss:$16 sps:$4 sm:$0xff]  }
 0x75c   : > { %v3402_v33 = vpop.eup %3401 }
 0x75d   : > { %v1434_v34 = vmul.f32 %v3402_v33, %v3398_v24  ;;  %v3323_v33 = vld [vmem:[%s4369_s12 + $0x60] ss:$16 sps:$4 sm:$0xff]  }
 0x75f   : > { %2809 = vst.msk [vmem:[%s4375_s14 + $0x8] sm:$0xff] %vm1186_vm4, %v1434_v34  ;;  %v1439_v39 = vpack.c.bf16 %v1434_v34, %v1434_v34  ;;  %v3326_v34 = vld [vmem:[%s4369_s12 + $0x68] ss:$16 sps:$4 sm:$0xff]  }
 0x765   : > { %v1431_v36 = vpop.xlane.xlu0 %1430 }
 0x766   : > { %3403 = vrcp.f32 %v1431_v36  ;;  %v3331_v36 = vld [vmem:[%s4369_s12 + $0x84] ss:$16 sps:$4 sm:$0xff]  }
 0x769   : > { %v1443_v37 = vpop.permute.xlu0 %1442 }
 0x76a   : > { %v1448_v38 = vsel %vm1216_vm2, %v1443_v37, 0  ;;  %v3334_v37 = vld [vmem:[%s4369_s12 + $0x8c] ss:$16 sps:$4 sm:$0xff]  }
 0x76b   : > { %3050 = vmatpush3.bf16.msra.mxu0 %v1448_v38  ;;  %v3329_v38 = vld [vmem:[%s4369_s12 + $0x80] ss:$16 sps:$4 sm:$0xff]  }
 0x76c   : > { %3061 = vmatprep.subr.bf16.mxu0 %v3821_v9 }
 0x76e   : > { %3052 = vmatmul.mubr.msk.bf16.vlgmr.msra.gmra.mrb[8].mxu0 %vm1186_vm4, %v1439_v39  ;;  %v3332_v39 = vld [vmem:[%s4369_s12 + $0x88] ss:$16 sps:$4 sm:$0xff]  }
 0x76f   : > { %3077 = vmatprep.mubr.msk.bf16.mxu0 %vm3823_vm0, %v3821_v9  ;;  %3062 = vmatpush3.bf16.msra.mxu0 %v3297_v42  ;;  %v3338_v42 = vld [vmem:[%s4369_s12 + $0xa8] ss:$16 sps:$4 sm:$0xff]  }
 0x770   : > { %v3404_v10 = vpop.eup %3403  ;;  %3063 = vmatprep.subr.bf16.mxu0 %v3821_v9 }
 0x771   : > { %v1435_v40 = vmul.f32 %v3404_v10, %v3400_v30  ;;  %v3320_v30 = vld [vmem:[%s4369_s12 + $0x48] ss:$16 sps:$4 sm:$0xff]   ;;  %v3337_v10 = vld [vmem:[%s4369_s12 + $0xa4] ss:$16 sps:$4 sm:$0xff]  }
 0x773   : > { %2810 = vst.msk [vmem:[%s4375_s14 + $0x18] sm:$0xff] %vm1186_vm4, %v1435_v40  ;;  %v1440_v41 = vpack.c.bf16 %v1435_v40, %v1435_v40  ;;  %3064 = vmatpush3.bf16.msra.mxu0 %v3298_v43  ;;  %v3340_v40 = vld [vmem:[%s4369_s12 + $0xac] ss:$16 sps:$4 sm:$0xff]   ;;  %v3343_v43 = vld [vmem:[%s4369_s12 + $0xc4] ss:$16 sps:$4 sm:$0xff]  }
 0x774   : > { %3065 = vmatprep.subr.bf16.mxu0 %v3821_v9 }
 0x775   : > { %3058 = vmatmul.mubr.msk.bf16.vlgmr.msra.gmra.mrb[24].mxu1 %vm1186_vm4, %v1440_v41  ;;  %v3335_v41 = vld [vmem:[%s4369_s12 + $0xa0] ss:$16 sps:$4 sm:$0xff]  }
 0x776   : > { %1951 = vmatprep.mubr.bf16.mxu1 %v3822_v35  ;;  %1920 = vmatpush1.bf16.msra.mxu1 %v3305_v12  ;;  %v3357_v12 = vld [vmem:[%s4371_s1 + $0x48] sm:$0xff]  }
 0x777   : > { %3066 = vmatpush3.bf16.msra.mxu0 %v3299_v44  ;;  %1921 = vmatprep.subr.bf16.mxu1 %v3313_v18  ;;  %v3346_v44 = vld [vmem:[%s4369_s12 + $0xcc] ss:$16 sps:$4 sm:$0xff]   ;;  %v3361_v18 = vld [vmem:[%s4371_s1 + $0x50] sm:$0xff]  }
 0x778   : > { %3067 = vmatprep.subr.bf16.mxu0 %v3821_v9 }
 0x77b   : > { %3068 = vmatpush3.bf16.msra.mxu0 %v3300_v45  ;;  %v3341_v45 = vld [vmem:[%s4369_s12 + $0xc0] ss:$16 sps:$4 sm:$0xff]  }
 0x77c   : > { %3069 = vmatprep.subr.bf16.mxu0 %v3821_v9 }
 0x77f   : > { %3070 = vmatpush3.bf16.msra.mxu0 %v3301_v46  ;;  %v3344_v46 = vld [vmem:[%s4369_s12 + $0xc8] ss:$16 sps:$4 sm:$0xff]  }
 0x780   : > { %3071 = vmatprep.subr.bf16.mxu0 %v3821_v9 }
 0x783   : > { %3072 = vmatpush3.bf16.msra.mxu0 %v3302_v47  ;;  %v3349_v47 = vld [vmem:[%s4369_s12 + $0xe4] ss:$16 sps:$4 sm:$0xff]  }
 0x784   : > { %3073 = vmatprep.subr.bf16.mxu0 %v3821_v9 }
 0x787   : > { %3074 = vmatpush3.bf16.msra.mxu0 %v3303_v48  ;;  %v3347_v48 = vld [vmem:[%s4369_s12 + $0xe0] ss:$16 sps:$4 sm:$0xff]  }
 0x788   : > { %3075 = vmatprep.subr.bf16.mxu0 %v3821_v9 }
 0x78b   : > { %3076 = vmatpush3.bf16.msra.mxu0 %v3304_v49  ;;  %v3350_v49 = vld [vmem:[%s4369_s12 + $0xe8] ss:$16 sps:$4 sm:$0xff]  }
 0x78c   : > { %1962 = vmatprep.subr.bf16.mxu0 %v3310_v17  ;;  %v3360_v17 = vld [vmem:[%s4371_s1 + $0x88] sm:$0xff]  }
 0x841   : > { %v1484_v50 = vpop.f32.mrb[8].mxu0 }
 0x842   : > { %v3053_v51 = vpop.f32.mrb[9].mxu0 }
 0x843   : > { %v1487_v52 = vpop.f32.mrb[10].mxu0 }
 0x844   : > { %v3054_v53 = vpop.f32.mrb[11].mxu0 }
 0x848   : > { %v1533_v54 = vpop.f32.mrb[24].mxu1 }
 0x849   : > { %v3260_v55 = vpack.i.bf16 %v1533_v54, %v1484_v50  ;;  %v3059_v56 = vpop.f32.mrb[25].mxu1  ;;  %v3352_v50 = vld [vmem:[%s4369_s12 + $0xec] ss:$16 sps:$4 sm:$0xff]  }
 0x84a   : > { %v1536_v57 = vpop.f32.mrb[26].mxu1 }
 0x84b   : > { %3261 = vrot.lane.b32.xlu1 %v3260_v55, %s3824_s26  ;;  %v3060_v58 = vpop.f32.mrb[27].mxu1 }
 0x8bd   : > { %v3262_v59 = vpop.permute.xlu1 %3261 }
 0x8be   : > { %v3264_v60 = vunpack.i.h.bf16 %v3262_v59  ;;  %v3263_v62 = vunpack.i.l.bf16 %v3262_v59  ;;  %v2822_v59 = vld [vmem:[%s770_s30] ss:$0 sm:$0xff] }
 0x8c0   : > { %v1548_v9 = vsel %vm1087_vm1, %v4520_v4, %v3264_v60  ;;  %v1547_v63 = vsel %vm1087_vm1, %v4514_v61, %v3263_v62 }
 0x8c1   : > { %v1549_v0 = vpack.c.bf16 %v1548_v9, %v1547_v63  ;;  %v2823_v63 = vld [vmem:[%s773_s0] ss:$0 sm:$0xff] }
 0x8c3   : > { %3078 = vmatmul.mubr.bf16.vlgmr.msra.gmra.mrb[12].mxu0 %v1549_v0 }
 0x8c4   : > { %1994 = vmatprep.mubr.bf16.mxu0 %v3822_v35  ;;  %1963 = vmatpush1.bf16.msra.mxu0 %v3308_v16  ;;  %v3359_v16 = vld [vmem:[%s4371_s1 + $0x8] sm:$0xff]  }
 0x8c5   : > { %1964 = vmatprep.subr.bf16.mxu0 %v3316_v19  ;;  %v3362_v19 = vld [vmem:[%s4371_s1 + $0xd0] sm:$0xff]  }
 0x996   : > { %v1655_v2 = vpop.f32.mrb[12].mxu0 }
 0x997   : > { %v1656_v3 = vadd.f32 %v2813_v1, %v1655_v2  ;;  %v3079_v4 = vpop.f32.mrb[13].mxu0 }
 0x998   : > { %v1658_v7 = vpop.f32.mrb[14].mxu0  ;;  %v3353_v4 = vld [vmem:[%s4371_s1 + $0x40] sm:$0xff]  }
 0x999   : > { %v4570_v61 = vadd.f32 %v1656_v3, %v4383_v5  ;;  %v1659_v8 = vadd.f32 %v2813_v1, %v1658_v7  ;;  %v3080_v11 = vpop.f32.mrb[15].mxu0  ;;  %v3311_v5 = vld [vmem:[%s4369_s12 + $0x20] ss:$16 sps:$4 sm:$0xff]  }
 0x99a   : > { %1922 = vmatpush1.bf16.msra.mxu1 %v3311_v5  ;;  %v3354_v7 = vld [vmem:[%s4371_s1 + $0xc0] sm:$0xff]   ;;  %v3363_v5 = vld [vmem:[%s4371_s1 + $0x10] sm:$0xff]  }
 0x99b   : > { %v4573_v35 = vadd.f32 %v1659_v8, %v4386_v6  ;;  %1666 = vadd.xlane.f32.xlu1 %v4570_v61  ;;  %v3314_v6 = vld [vmem:[%s4369_s12 + $0x28] ss:$16 sps:$4 sm:$0xff]   ;;  %1923 = vmatprep.subr.bf16.mxu1 %v3319_v28  ;;  %v3355_v8 = vld [vmem:[%s4371_s1] sm:$0xff]  }
 0x99c   : > { %1965 = vmatpush1.bf16.msra.mxu0 %v3314_v6  ;;  %v3356_v11 = vld [vmem:[%s4371_s1 + $0x80] sm:$0xff]   ;;  %v3364_v6 = vld [vmem:[%s4371_s1 + $0x90] sm:$0xff]   ;;  %v3373_v28 = vld [vmem:[%s4371_s1 + $0x68] sm:$0xff]  }
 0x99d   : > { %1668 = vadd.xlane.f32.xlu0 %v4573_v35  ;;  %1966 = vmatprep.subr.bf16.mxu0 %v3322_v29  ;;  %v3374_v29 = vld [vmem:[%s4371_s1 + $0xe8] sm:$0xff]  }
 0x99e   : > { %1924 = vmatpush1.bf16.msra.mxu1 %v3317_v15  ;;  %v3375_v15 = vld [vmem:[%s4371_s1 + $0x28] sm:$0xff]  }
 0x99f   : > { %1925 = vmatprep.subr.bf16.mxu1 %v3325_v31  ;;  %v3377_v31 = vld [vmem:[%s4371_s1 + $0x70] sm:$0xff]  }
 0x9a0   : > { %1967 = vmatpush1.bf16.msra.mxu0 %v3320_v30  ;;  %v3376_v30 = vld [vmem:[%s4371_s1 + $0xa8] sm:$0xff]  }
 0x9a1   : > { %1968 = vmatprep.subr.bf16.mxu0 %v3328_v32  ;;  %v3378_v32 = vld [vmem:[%s4371_s1 + $0xf0] sm:$0xff]  }
 0x9a2   : > { %1926 = vmatpush1.bf16.msra.mxu1 %v3323_v33  ;;  %v3379_v33 = vld [vmem:[%s4371_s1 + $0x30] sm:$0xff]  }
 0x9a3   : > { %1927 = vmatprep.subr.bf16.mxu1 %v3331_v36  ;;  %v3381_v36 = vld [vmem:[%s4371_s1 + $0x78] sm:$0xff]  }
 0x9a4   : > { %1969 = vmatpush1.bf16.msra.mxu0 %v3326_v34  ;;  %v3380_v34 = vld [vmem:[%s4371_s1 + $0xb0] sm:$0xff]  }
 0x9a5   : > { %1970 = vmatprep.subr.bf16.mxu0 %v3334_v37  ;;  %v3382_v37 = vld [vmem:[%s4371_s1 + $0xf8] sm:$0xff]  }
 0x9a6   : > { %1928 = vmatpush1.bf16.msra.mxu1 %v3329_v38  ;;  %v3383_v38 = vld [vmem:[%s4371_s1 + $0x38] sm:$0xff]  }
 0x9a7   : > { %1929 = vmatprep.subr.bf16.mxu1 %v3337_v10  ;;  %v1741_v10 = vsub.s32 0, %v4470_v14 }
 0x9a8   : > { %1971 = vmatpush1.bf16.msra.mxu0 %v3332_v39  ;;  %v3384_v39 = vld [vmem:[%s4371_s1 + $0xb8] sm:$0xff]  }
 0x9a9   : > { %1972 = vmatprep.subr.bf16.mxu0 %v3340_v40  ;;  %v1749_v40 = vsub.s32 2, %v4470_v14 }
 0x9aa   : > { %1930 = vmatpush1.bf16.msra.mxu1 %v3335_v41  ;;  %v1737_v41 = vld [vmem:[%s4345_s9] sm:$0xf] }
 0x9ab   : > { %1931 = vmatprep.subr.bf16.mxu1 %v3343_v43  ;;  %v1753_v43 = vsub.s32 3, %v4470_v14 }
 0x9ac   : > { %1973 = vmatpush1.bf16.msra.mxu0 %v3338_v42  ;;  %v1745_v42 = vsub.s32 1, %v4470_v14 }
 0x9ad   : > { %1974 = vmatprep.subr.bf16.mxu0 %v3346_v44  ;;  %v1742_v44 = vrot.slane %v1737_v41, %v1741_v10 }
 0x9ae   : > { %1932 = vmatpush1.bf16.msra.mxu1 %v3341_v45  ;;  %v1750_v45 = vrot.slane %v1737_v41, %v1749_v40 }
 0x9af   : > { %1933 = vmatprep.subr.bf16.mxu1 %v3349_v47  ;;  %v1754_v47 = vrot.slane %v1737_v41, %v1753_v43 }
 0x9b0   : > { %1975 = vmatpush1.bf16.msra.mxu0 %v3344_v46  ;;  %v1746_v46 = vrot.slane %v1737_v41, %v1745_v42 }
 0x9b1   : > { %1976 = vmatprep.subr.bf16.mxu0 %v3352_v50 }
 0x9b2   : > { %1934 = vmatpush1.bf16.msra.mxu1 %v3347_v48 }
 0x9b3   : > { %2949 = vmatprep.subr.bf16.mxu1 %v3353_v4 }
 0x9b4   : > { %1977 = vmatpush1.bf16.msra.mxu0 %v3350_v49 }
 0x9b5   : > { %2971 = vmatprep.subr.bf16.mxu0 %v3354_v7 }
 0xa28   : > { %v1667_v20 = vpop.xlane.xlu1 %1666 }
 0xa29   : > { %v1670_v21 = vmul.f32 0.0078125, %v1667_v20  ;;  %v3365_v20 = vld [vmem:[%s4371_s1 + $0x58] sm:$0xff]  }
 0xa2a   : > { %v1669_v22 = vpop.xlane.xlu0 %1668 }
 0xa2b   : > { %v4586_v23 = vsub.f32 %v4570_v61, %v1670_v21  ;;  %v1671_v24 = vmul.f32 0.0078125, %v1669_v22  ;;  %v3366_v21 = vld [vmem:[%s4371_s1 + $0xd8] sm:$0xff]  }
 0xa2c   : > { %v3367_v22 = vld [vmem:[%s4371_s1 + $0x18] sm:$0xff]  }
 0xa2d   : > { %v4589_v25 = vsub.f32 %v4573_v35, %v1671_v24  ;;  %v1674_v26 = vmul.f32 %v4586_v23, %v4586_v23  ;;  %v3369_v24 = vld [vmem:[%s4371_s1 + $0x60] sm:$0xff]  }
 0xa2f   : > { %1676 = vadd.xlane.f32.xlu0 %v1674_v26  ;;  %v1675_v27 = vmul.f32 %v4589_v25, %v4589_v25  ;;  %v3371_v26 = vld [vmem:[%s4371_s1 + $0x20] sm:$0xff]  }
 0xa33   : > { %1678 = vadd.xlane.f32.xlu0 %v1675_v27  ;;  %v3372_v27 = vld [vmem:[%s4371_s1 + $0xa0] sm:$0xff]  }
 0xabc   : > { %v1677_v51 = vpop.xlane.xlu0 %1676 }
 0xabd   : > { %v1680_v52 = vmul.f32 0.0078125, %v1677_v51 }
 0xabf   : > { %v1682_v53 = vadd.f32 1e-05, %v1680_v52 }
 0xac0   : > { %v1679_v54 = vpop.xlane.xlu0 %1678 }
 0xac1   : > { %3405 = vrsqrt.f32 %v1682_v53  ;;  %v1681_v55 = vmul.f32 0.0078125, %v1679_v54 }
 0xac3   : > { %v1683_v56 = vadd.f32 1e-05, %v1681_v55 }
 0xac5   : > { %3407 = vrsqrt.f32 %v1683_v56 }
 0xacb   : > { %v3406_v57 = vpop.eup %3405 }
 0xacc   : > { %v1686_v58 = vmul.f32 %v3406_v57, %v4586_v23  ;;  %v3368_v23 = vld [vmem:[%s4371_s1 + $0x98] sm:$0xff]  }
 0xace   : > { %v1694_v9 = vmul.f32 %v2822_v59, %v1686_v58 }
 0xacf   : > { %v3408_v60 = vpop.eup %3407 }
 0xad0   : > { %v1687_v62 = vmul.f32 %v3408_v60, %v4589_v25  ;;  %v1702_v1 = vadd.f32 %v2823_v63, %v1694_v9  ;;  %v3370_v25 = vld [vmem:[%s4371_s1 + $0xe0] sm:$0xff]  }
 0xad2   : > { %v1695_v0 = vmul.f32 %v2822_v59, %v1687_v62 }
 0xad4   : > { %v1703_v2 = vadd.f32 %v2823_v63, %v1695_v0 }
 0xad6   : > { %v1704_v3 = vpack.c.bf16 %v1703_v2, %v1702_v1 }
 0xad8   : > { %1952 = vmatmul.mubr.bf16.vlgmr.msra.gmra.mrb[28].mxu1 %v1704_v3  ;;  %1995 = vmatmul.mubr.bf16.vlgmr.msra.gmra.mrb[16].mxu0 %v1704_v3 }
 0xad9   : > { %2950 = vmatpush3.bf16.msra.mxu1 %v3355_v8  ;;  %2972 = vmatpush3.bf16.msra.mxu0 %v3356_v11 }
 0xada   : > { %2951 = vmatprep.subr.bf16.mxu1 %v3357_v12  ;;  %2973 = vmatprep.subr.bf16.mxu0 %v3358_v13 }
 0xadd   : > { %2952 = vmatpush3.bf16.msra.mxu1 %v3359_v16  ;;  %2974 = vmatpush3.bf16.msra.mxu0 %v3360_v17 }
 0xade   : > { %2953 = vmatprep.subr.bf16.mxu1 %v3361_v18  ;;  %2975 = vmatprep.subr.bf16.mxu0 %v3362_v19 }
 0xae1   : > { %2954 = vmatpush3.bf16.msra.mxu1 %v3363_v5  ;;  %2976 = vmatpush3.bf16.msra.mxu0 %v3364_v6 }
 0xae2   : > { %2955 = vmatprep.subr.bf16.mxu1 %v3365_v20  ;;  %2977 = vmatprep.subr.bf16.mxu0 %v3366_v21 }
 0xae5   : > { %2956 = vmatpush3.bf16.msra.mxu1 %v3367_v22  ;;  %2978 = vmatpush3.bf16.msra.mxu0 %v3368_v23 }
 0xae6   : > { %2957 = vmatprep.subr.bf16.mxu1 %v3369_v24  ;;  %2979 = vmatprep.subr.bf16.mxu0 %v3370_v25 }
 0xae9   : > { %2958 = vmatpush3.bf16.msra.mxu1 %v3371_v26  ;;  %2980 = vmatpush3.bf16.msra.mxu0 %v3372_v27 }
 0xaea   : > { %2959 = vmatprep.subr.bf16.mxu1 %v3373_v28  ;;  %2981 = vmatprep.subr.bf16.mxu0 %v3374_v29 }
 0xaed   : > { %2960 = vmatpush3.bf16.msra.mxu1 %v3375_v15  ;;  %2982 = vmatpush3.bf16.msra.mxu0 %v3376_v30 }
 0xaee   : > { %2961 = vmatprep.subr.bf16.mxu1 %v3377_v31  ;;  %2983 = vmatprep.subr.bf16.mxu0 %v3378_v32 }
 0xaf1   : > { %2962 = vmatpush3.bf16.msra.mxu1 %v3379_v33  ;;  %2984 = vmatpush3.bf16.msra.mxu0 %v3380_v34 }
 0xaf2   : > { %2963 = vmatprep.subr.bf16.mxu1 %v3381_v36  ;;  %2985 = vmatprep.subr.bf16.mxu0 %v3382_v37 }
 0xaf5   : > { %2964 = vmatpush3.bf16.msra.mxu1 %v3383_v38  ;;  %2986 = vmatpush3.bf16.msra.mxu0 %v3384_v39 }
 0xbab   : > { %v1953_v48 = vpop.f32.mrb[28].mxu1  ;;  %v1996_v49 = vpop.f32.mrb[16].mxu0 }
 0xbac   : > { %v4668_v50 = vadd.f32 %v1953_v48, %v1742_v44  ;;  %v4670_v51 = vadd.f32 %v1996_v49, %v1750_v45  ;;  %v1955_v52 = vpop.f32.mrb[29].mxu1  ;;  %v1998_v53 = vpop.f32.mrb[17].mxu0 }
 0xbad   : > { %v4672_v54 = vadd.f32 %v1955_v52, %v1746_v46  ;;  %v4674_v55 = vadd.f32 %v1998_v53, %v1754_v47  ;;  %v1957_v56 = vpop.f32.mrb[30].mxu1  ;;  %v2000_v57 = vpop.f32.mrb[18].mxu0 }
 0xbae   : > { %v2856_v14 = vmul.f32 -1.702, %v4668_v50  ;;  %v2858_v58 = vmul.f32 -1.702, %v4670_v51  ;;  %v1958_v59 = vadd.f32 %v1957_v56, %v1742_v44  ;;  %v2001_v60 = vadd.f32 %v2000_v57, %v1750_v45  ;;  %v1959_v62 = vpop.f32.mrb[31].mxu1  ;;  %v2002_v9 = vpop.f32.mrb[19].mxu0 }
 0xbaf   : > { %v2857_v63 = vmul.f32 -1.702, %v4672_v54  ;;  %v2859_v0 = vmul.f32 -1.702, %v4674_v55  ;;  %v1960_v1 = vadd.f32 %v1959_v62, %v1746_v46  ;;  %v2003_v2 = vadd.f32 %v2002_v9, %v1754_v47 }
 0xbb0   : > { %v2021_v3 = vmul.f32 1.442695, %v2856_v14  ;;  %v2025_v4 = vmul.f32 1.442695, %v2858_v58  ;;  %v2860_v7 = vmul.f32 -1.702, %v1958_v59 }
 0xbb1   : > { %v2023_v8 = vmul.f32 1.442695, %v2857_v63  ;;  %v2027_v11 = vmul.f32 1.442695, %v2859_v0  ;;  %v2862_v12 = vmul.f32 -1.702, %v2001_v60 }
 0xbb2   : > { %3409 = vpow2.f32 %v2021_v3  ;;  %v2029_v13 = vmul.f32 1.442695, %v2860_v7  ;;  %v2861_v16 = vmul.f32 -1.702, %v1960_v1  ;;  %v2863_v17 = vmul.f32 -1.702, %v2003_v2 }
 0xbb3   : > { %3411 = vpow2.f32 %v2025_v4  ;;  %v2033_v18 = vmul.f32 1.442695, %v2862_v12  ;;  %v2424_v12 = vld [vmem:[%s4313_s11] sm:$0xff] (!%p2897_p9) }
 0xbb4   : > { %3413 = vpow2.f32 %v2023_v8  ;;  %v2031_v19 = vmul.f32 1.442695, %v2861_v16  ;;  %v2035_v5 = vmul.f32 1.442695, %v2863_v17 }
 0xbb5   : > { %3415 = vpow2.f32 %v2027_v11 }
 0xbb6   : > { %3417 = vpow2.f32 %v2029_v13  ;;  %v2425_v13 = vld [vmem:[%s4313_s11 + $0x8] sm:$0xff] (!%p2897_p9) }
 0xbb7   : > { %3419 = vpow2.f32 %v2033_v18 }
 0xbb8   : > { %3421 = vpow2.f32 %v2031_v19 }
 0xbb9   : > { %3423 = vpow2.f32 %v2035_v5 }
 0xbbc   : > { %v3410_v6 = vpop.eup %3409 }
 0xbbd   : > { %v3412_v20 = vpop.eup %3411  ;;  %v2037_v21 = vadd.f32 1.0, %v3410_v6 }
 0xbbe   : > { %v3414_v22 = vpop.eup %3413  ;;  %v2039_v23 = vadd.f32 1.0, %v3412_v20 }
 0xbbf   : > { %v3416_v24 = vpop.eup %3415  ;;  %3425 = vrcp.f32 %v2037_v21  ;;  %v2038_v25 = vadd.f32 1.0, %v3414_v22 }
 0xbc0   : > { %v3418_v26 = vpop.eup %3417  ;;  %3427 = vrcp.f32 %v2039_v23  ;;  %v2040_v27 = vadd.f32 1.0, %v3416_v24 }
 0xbc1   : > { %v3420_v28 = vpop.eup %3419  ;;  %3429 = vrcp.f32 %v2038_v25  ;;  %v2041_v29 = vadd.f32 1.0, %v3418_v26 }
 0xbc2   : > { %v3422_v15 = vpop.eup %3421  ;;  %3431 = vrcp.f32 %v2040_v27  ;;  %v2043_v30 = vadd.f32 1.0, %v3420_v28 }
 0xbc3   : > { %v3424_v31 = vpop.eup %3423  ;;  %3433 = vrcp.f32 %v2041_v29  ;;  %v2042_v32 = vadd.f32 1.0, %v3422_v15 }
 0xbc4   : > { %3435 = vrcp.f32 %v2043_v30  ;;  %v2044_v33 = vadd.f32 1.0, %v3424_v31 }
 0xbc5   : > { %3437 = vrcp.f32 %v2042_v32 }
 0xbc6   : > { %3439 = vrcp.f32 %v2044_v33 }
 0xbc9   : > { %v3426_v34 = vpop.eup %3425 }
 0xbca   : > { %v3428_v36 = vpop.eup %3427  ;;  %v2061_v40 = vmul.f32 %v3426_v34, %v4668_v50 }
 0xbcb   : > { %v3430_v37 = vpop.eup %3429  ;;  %v2063_v43 = vmul.f32 %v3428_v36, %v4670_v51  ;;  %v2864_v51 = vld [vmem:[%s761_s17] ss:$0 sm:$0xff] }
 0xbcc   : > { %v3432_v38 = vpop.eup %3431  ;;  %v2062_v46 = vmul.f32 %v3430_v37, %v4672_v54 }
 0xbcd   : > { %v3434_v39 = vpop.eup %3433  ;;  %v2064_v49 = vmul.f32 %v3432_v38, %v4674_v55 }
 0xbce   : > { %v3436_v10 = vpop.eup %3435  ;;  %v2065_v41 = vmul.f32 %v3434_v39, %v1958_v59 }
 0xbcf   : > { %v3438_v42 = vpop.eup %3437  ;;  %v2067_v44 = vmul.f32 %v3436_v10, %v2001_v60 }
 0xbd0   : > { %v3440_v45 = vpop.eup %3439  ;;  %v2069_v47 = vpack.c.bf16 %v2065_v41, %v2061_v40  ;;  %v2066_v48 = vmul.f32 %v3438_v42, %v1960_v1 }
 0xbd1   : > { %v2071_v52 = vpack.c.bf16 %v2067_v44, %v2063_v43  ;;  %v2068_v53 = vmul.f32 %v3440_v45, %v2003_v2 }
 0xbd2   : > { %v2070_v56 = vpack.c.bf16 %v2066_v48, %v2062_v46 }
 0xbd3   : > { %v2072_v57 = vpack.c.bf16 %v2068_v53, %v2064_v49 }
 0xbd4   : > { %2368 = vmatprep.mubr.bf16.mxu1 %v2070_v56 }
 0xbd5   : > { %2409 = vmatprep.mubr.bf16.mxu0 %v2072_v57  ;;  %2369 = vmatmul.mubr.bf16.vlgmr.msra.gmra.mrb[32].mxu1 %v2069_v47 }
 0xbd6   : > { %2410 = vmatmul.mubr.bf16.vlgmr.msra.gmra.mrb[20].mxu0 %v2071_v52 }
 0xca8   : > { %v2965_v50 = vpop.f32.mrb[32].mxu1 }
 0xca9   : > { %v2987_v14 = vpop.f32.mrb[20].mxu0  ;;  %v2966_v54 = vpop.f32.mrb[33].mxu1 }
 0xcaa   : > { %v2967_v58 = vadd.f32 %v2966_v54, %v2965_v50  ;;  %v2988_v59 = vpop.f32.mrb[21].mxu0  ;;  %v2968_v60 = vpop.f32.mrb[34].mxu1 }
 0xcab   : > { %v2989_v55 = vadd.f32 %v2988_v59, %v2987_v14  ;;  %v2990_v62 = vpop.f32.mrb[22].mxu0  ;;  %v2969_v9 = vpop.f32.mrb[35].mxu1 }
 0xcac   : > { %v2371_v63 = vadd.f32 %v2967_v58, %v2864_v51  ;;  %v2970_v0 = vadd.f32 %v2969_v9, %v2968_v60  ;;  %v2991_v1 = vpop.f32.mrb[23].mxu0  ;;  %2423 = sbr.rel (%p2897_p9) target bundleno = 3255 (0xcb7), region = 104 }
 0xcad   : > { %v2992_v2 = vadd.f32 %v2991_v1, %v2990_v62 }
 0xcae   : > { %v2412_v3 = vadd.f32 %v2989_v55, %v2371_v63  ;;  %v2374_v4 = vadd.f32 %v2970_v0, %v2864_v51 }
 0xcb0   : > { %v2418_v7 = vadd.f32 %v2412_v3, %v4570_v61  ;;  %v2415_v8 = vadd.f32 %v2992_v2, %v2374_v4 }
 0xcb2   : > { %v2419_v11 = vadd.f32 %v2415_v8, %v4573_v35  ;;  %v2426_v16 = vadd.f32 (!%p2897_p9), %v2424_v12, %v2418_v7 }
 0xcb4   : > { %v2427_v17 = vadd.f32 %v2425_v13, %v2419_v11  ;;  %2428 = vst [vmem:[%s4373_s15] sm:$0xff] %v2426_v16 }
 0xcb6   : > { %2429 = vst [vmem:[%s4373_s15 + $0x8] sm:$0xff] %v2427_v17 }
 0xcb7 PF: > { %s4976_s17 = sld [smem:[#allocation26_spill]] }
 0xcbd   : > { %p2898_p3 = scmp.ge.s32.totalorder %s4976_s17, 1 }
 0xcbe   : > { %2434 = vst [vmem:[%s4373_s15] sm:$0xff] (!%p2898_p3), %v2418_v7  ;;  %2435 = vst [vmem:[%s4373_s15 + $0x8] sm:$0xff] (!%p2898_p3), %v2419_v11 }
 0xcbf   : > { %2433 = sbr.rel (%p2898_p3) target bundleno = 3270 (0xcc6), region = 108 }
 0xcc6 PF: > { %s4977_s18 = sld [smem:[#allocation27_spill]]  ;;  %s4978_s0 = sld [smem:[#allocation35_spill]] }
 0xcc7   : > { %s4979_s1 = sld [smem:[#allocation53_spill]]  ;;  %s2455_s13 = sshll.u32 %s4373_s15, 4  ;;  %s4706_s13 = int_to_ptr.vmem [resolvable:$true] %s2455_s13 }
 0xcc8   : > { %s4980_s16 = sand.u32 1, %s3781_s20   ;;  %s3619_s2 = scalar_lea.vmem %s4706_s13, 256 }
 0xcc9   : > { %s4710_s27 = scalar_lea.sflag [#allocation4], %s4980_s16  ;;  %p3620_p10 = scmp.ne.s32.totalorder %s4706_s13, %s3619_s2 }
 0xcca   : > { %s3825_s24 = smov [#allocation11]  }
 0xccb   : > { %s3623_s26 = sshll.u32 %s3825_s24, 4  ;;  %s3624_s26 = int_to_ptr.vmem [resolvable:$false] %s3623_s26 }
 0xccc   : > { %s2913_s6 = sshll.u32 %s4977_s18, 8  ;;  %p4981_p1 = scmp.ne.s32.totalorder %s4978_s0, 0 }
 0xccd   : > { %s4703_s19 = scalar_lea.hbm %s4979_s1, %s2913_s6  ;;  %s3625_s8 = scalar_lea.vmem %s3624_s26, 512 }
 0xcce   : > { %p3621_p11 = pnand %p3620_p10, %p4981_p1  ;;  %p3626_p2 = scmp.lt.s32.totalorder %s4706_s13, %s3624_s26 }
 0xccf   : > { %p3627_p7 = scmp.lt.s32.totalorder %s3625_s8, %s3619_s2 }
 0xcd0   : > { %p3622_p4 = pneg %p3621_p11 }
 0xcd1   : > { %p3628_p5 = por %p3627_p7, %p3626_p2 }
 0xcd3   : > { %p3629_p12 = pnand %p3628_p5, %p3622_p4 }
 0xcd5   : > { %3632 = shalt.err (!%p3629_p12)
}
 0xcd6   : > { %s3633_s15 = scalar_lea.hbm %s4703_s19, 256  ;;  %s3637_s22 = scalar_lea.hbm %s4979_s1, 512 }
 0xcd7   : > { %p3634_p0 = scmp.ne.s32.totalorder %s4703_s19, %s3633_s15  ;;  %p3638_p13 = scmp.lt.u32.totalorder %s4703_s19, %s4979_s1 }
 0xcd8   : > { %p3639_p9 = scmp.lt.u32.totalorder %s3637_s22, %s3633_s15  ;;  %p3641_p10 = scmp.lt.u32.totalorder %s3633_s15, %s4703_s19 }
 0xcd9   : > { %p3635_p6 = pnand %p3634_p0, %p4981_p1 }
 0xcda   : > { %p3640_p3 = por %p3639_p9, %p3638_p13 }
 0xcdb   : > { %p3636_p8 = pneg %p3635_p6 }
 0xcdc   : > { %p3642_p11 = por %p3641_p10, %p3640_p3 }
 0xcde   : > { %p3643_p4 = pnand %p3642_p11, %p3636_p8 }
 0xce0   : > { %3646 = shalt.err (!%p3643_p4)
}
 0xce1   : > { %s3826_s28 = smov 128   ;;  %s4982_s21 = sld [smem:[#allocation26_spill]] }
 0xce2   : > { %s4983_s5 = sld [smem:[#allocation20_spill]]  ;;  %s4984_s3 = sld [smem:[#allocation38_spill]] }
 0xce3   : > { %s3827_s30 = smov 8   ;;  %s2914_s9 = sshll.u32 %s4977_s18, 2 }
 0xce4   : > { %3098 = dma.vmem_to_hbm [thread:$0]  (%p4981_p1), %s4706_s13, 256, %s4703_s19, %s4710_s27, %s3826_s28, %s3826_s28, %s3827_s30  }
 0xce5   : > { %s2474_s17 = sshll.u32 %s4375_s14, 4  ;;  %s4985_s16 = sld [smem:[#allocation54_spill]]  ;;  %s4740_s17 = int_to_ptr.vmem [resolvable:$true] %s2474_s17 }
 0xce6   : > { %s3647_s8 = scalar_lea.vmem %s4740_s17, 512  ;;  %s3828_s14 = smov [#allocation12]  }
 0xce7   : > { %s2905_s10 = sshll.u32 %s4982_s21, 3  ;;  %p3648_p1 = scmp.ne.s32.totalorder %s4740_s17, %s3647_s8 }
 0xce8   : > { %s2471_s7 = sadd.s32 %s2914_s9, %s2905_s10  ;;  %s4987_s0 = sand.u32 1, %s4983_s5  }
 0xce9   : > { %s2906_s6 = sshll.u32 %s2471_s7, 7  ;;  %s4749_s26 = scalar_lea.sflag [#allocation13], %s4987_s0 }
 0xcea   : > { %p4988_p2 = scmp.ne.s32.totalorder %s4984_s3, 0  ;;  %s3651_s18 = sshll.u32 %s3828_s14, 4  ;;  %s3652_s18 = int_to_ptr.vmem [resolvable:$false] %s3651_s18 }
 0xceb   : > { %s4986_s2 = smov %s4985_s16  ;;  %s4745_s24 = scalar_lea.hbm %s4985_s16, %s2906_s6 }
 0xcec   : > { %p3649_p7 = pnand %p3648_p1, %p4988_p2  ;;  %s3653_s19 = scalar_lea.vmem %s3652_s18, 1024 }
 0xced   : > { %p3654_p12 = scmp.lt.s32.totalorder %s4740_s17, %s3652_s18  ;;  %p3655_p0 = scmp.lt.s32.totalorder %s3653_s19, %s3647_s8 }
 0xcee   : > { %p3650_p5 = pneg %p3649_p7 }
 0xcef   : > { %p3656_p6 = por %p3655_p0, %p3654_p12 }
 0xcf1   : > { %p3657_p8 = pnand %p3656_p6, %p3650_p5 }
 0xcf3   : > { %3660 = shalt.err (!%p3657_p8)
}
 0xcf4   : > { %s3661_s13 = scalar_lea.hbm %s4745_s24, 512  ;;  %s3665_s29 = scalar_lea.hbm %s4986_s2, 2048 }
 0xcf5   : > { %p3662_p13 = scmp.ne.s32.totalorder %s4745_s24, %s3661_s13  ;;  %p3666_p10 = scmp.lt.u32.totalorder %s4745_s24, %s4986_s2 }
 0xcf6   : > { %p3667_p11 = scmp.lt.u32.totalorder %s3665_s29, %s3661_s13  ;;  %p3669_p1 = scmp.lt.u32.totalorder %s3661_s13, %s4745_s24 }
 0xcf7   : > { %p3663_p9 = pnand %p3662_p13, %p4988_p2 }
 0xcf8   : > { %p3668_p4 = por %p3667_p11, %p3666_p10 }
 0xcf9   : > { %p3664_p3 = pneg %p3663_p9 }
 0xcfa   : > { %p3670_p7 = por %p3669_p1, %p3668_p4 }
 0xcfc   : > { %p3671_p5 = pnand %p3670_p7, %p3664_p3 }
 0xcfe   : > { %3674 = shalt.err (!%p3671_p5)
}
 0xcff   : > { %3099 = dma.vmem_to_hbm [thread:$0]  (%p4988_p2), %s4740_s17, 512, %s4745_s24, %s4749_s26, %s3826_s28, %s3826_s28, %s3827_s30  }
 0xd00 PF: > { %s4989_s25 = sld [smem:[#allocation30_spill]]  ;;  %s4990_s4 = sld [smem:[#allocation24_spill]] }
 0xd01   : > { %s4991_s21 = sld [smem:[#allocation36_spill]] }
 0xd06   : > { %p3132_p12 = scmp.ge.s32.totalorder %s4989_s25, 2  ;;  %s2489_s5 = sand.u32 1, %s4990_s4  }
 0xd07   : > { %p4992_p0 = scmp.ne.s32.totalorder %s4991_s21, 0  ;;  %s2490_s9 = scalar_lea.sflag [#allocation4], %s2489_s5 }
 0xd09   : > { %p3123_p6 = pnand %p3132_p12, %p4992_p0 }
 0xd0b   : > { %3744 = dma.done.wait (!%p3123_p6), %s2490_s9, 256  }
 0xd0c   : > { %3746 = vsyncadd (!%p3123_p6), %s2490_s9, 4294967040  ;;  %s4993_s10 = sld [smem:[#allocation19_spill]] }
 0xd0d   : > { %s4994_s3 = sld [smem:[#allocation39_spill]] }
 0xd12   : > { %s2498_s7 = sand.u32 1, %s4993_s10  }
 0xd13   : > { %p4995_p8 = scmp.ne.s32.totalorder %s4994_s3, 0  ;;  %s2499_s6 = scalar_lea.sflag [#allocation13], %s2498_s7 }
 0xd15   : > { %p3126_p13 = pnand %p3132_p12, %p4995_p8 }
 0xd17   : > { %3748 = dma.done.wait (!%p3126_p13), %s2499_s6, 512  }
 0xd18   : > { %3750 = vsyncadd (!%p3126_p13), %s2499_s6, 4294966784  ;;  %s35_s26 = sadd.s32 1, %s4989_s25   ;;  %s4997_s29 = sld [smem:[#allocation20_spill]] }
 0xd19   : > { %p4784_p2 = scmp.ge.s32.totalorder %s35_s26, 6   ;;  %s4998_s30 = sld [smem:[#allocation21_spill]] }
 0xd1a   : > { %s4999_s15 = sld [smem:[#allocation37_spill]]  ;;  %s5000_s16 = sld [smem:[#allocation22_spill]] }
 0xd1b   : > { %s5001_s17 = sld [smem:[#allocation23_spill]]  ;;  %s5002_s18 = sld [smem:[#allocation34_spill]] }
 0xd1c   : > { %s5003_s12 = sld [smem:[#allocation25_spill]]  ;;  %s5004_s21 = sld [smem:[#allocation33_spill]] }
 0xd1d   : > { %s5005_s22 = sld [smem:[#allocation28_spill]]  ;;  %s5006_s23 = sld [smem:[#allocation29_spill]] }
 0xd1e   : > { %s5007_s24 = sld [smem:[#allocation31_spill]]  ;;  %s5008_s25 = sld [smem:[#allocation32_spill]] }
 0xd1f   : > { %s5009_s19 = smov %s3781_s20  ;;  %34 = sbr.rel (!%p4784_p2) target bundleno = 29 (0x1d), region = 216 }
 0xd22   : > { %s5010_s20 = smov %s5003_s12 }
 0xd26   :  { %2504 = vsyncpa [#allocation3], 1 }
 0xd27   :  { %2506 = vsyncpa [#allocation3 + $0x1], 1 }
 0xd28   :  { %2507 = vsyncpa [#allocation6], 1 }
 0xd29   :  { %2508 = vsyncpa [#allocation4], 1 }
 0xd2a   :  { %2510 = vsyncpa [#allocation4 + $0x1], 1 }
 0xd2b   :  { %2511 = vsyncpa [#allocation13], 1 }
 0xd2c   :  { %2513 = vsyncpa [#allocation13 + $0x1], 1 }

</bundles_post_ra>
